<compile_context>
chip_gen: v7x
topology: tpu7x:2x2x1
jax: 0.10.0
libtpu: 0.0.40
codegen_flags: <defaults>
</compile_context>

<pallas_src>
import functools

import jax
import jax.numpy as jnp
from jax.experimental import pallas as pl
from jax.experimental.pallas import tpu as pltpu


def _rgcn_fused_kernel(num_layers, num_rels, n_nodes, feat_dim, compute_dtype,
                       adj_ref, feat_ref, w_ref, bias_ref, out_ref):
    """Whole RGCN stack in one invocation (grid=()).

    adj_ref : (N, R*N)     relations concatenated along source columns (bf16)
    feat_ref: (N, D)       input node features (f32; cast to bf16 in-kernel)
    w_ref   : (L, D, R*D)  pre-folded relation weights, concatenated along out cols (bf16)
    bias_ref: (L, 1, D)    per-layer bias (f32)
    out_ref : (N, D)       final node features (f32)
    """
    h = feat_ref[...].astype(compute_dtype)                     # (N, D) bf16

    for l in range(num_layers):                                  # static, unrolled
        # Stage 1: single wide-output matmul (N, D) @ (D, R*D) -> (N, R*D), f32 acc.
        msg = jnp.dot(h, w_ref[l], preferred_element_type=jnp.float32)
        msg_c = msg.astype(compute_dtype)                        # stays in vregs

        # Stage 2: R accumulating (N, N) x (N, D) matmuls; f32 accumulator never
        # touches VMEM between relations (no tmp scratch store -> reload).
        acc = jnp.dot(adj_ref[:, 0:n_nodes], msg_c[:, 0:feat_dim],
                      preferred_element_type=jnp.float32)
        for r in range(1, num_rels):                             # static, unrolled
            acc = acc + jnp.dot(
                adj_ref[:, r * n_nodes:(r + 1) * n_nodes],
                msg_c[:, r * feat_dim:(r + 1) * feat_dim],
                preferred_element_type=jnp.float32)

        h_f32 = acc + bias_ref[l]                                # f32 bias epilogue

        if l != num_layers - 1:
            h = jnp.maximum(h_f32, 0.0).astype(compute_dtype)    # fused inter-layer ReLU
        else:
            out_ref[...] = h_f32.astype(out_ref.dtype)


# ----------------------- one-time preprocessing (static graph / params) ----------
def prepare_graph(adj, compute_dtype=jnp.bfloat16):
    """adj (R, N, N) -> adj_flat (N, R*N): adj_flat[v, r*N + u] = adj[r, v, u]."""
    R, N, _ = adj.shape
    return jnp.transpose(adj, (1, 0, 2)).reshape(N, R * N).astype(compute_dtype)


def prepare_params(params, compute_dtype=jnp.bfloat16):
    """Fold basis decomposition and concatenate per-relation weights along out cols.

    Returns:
      w_cat    (L, D, R*D) with w_cat[l, i, r*D + j] = W_r[i, j]  (compute dtype)
      bias_all (L, 1, D)   f32
    """
    w_all = jnp.stack(
        [jnp.einsum('rb,bij->rij', wcomp, bases) for wcomp, bases, _ in params])   # (L,R,D,D)
    L, R, D, _ = w_all.shape
    w_cat = jnp.transpose(w_all, (0, 2, 1, 3)).reshape(L, D, R * D).astype(compute_dtype)
    bias_all = jnp.stack([bias for _, _, bias in params]).astype(jnp.float32)       # (L,1,D)
    return w_cat, bias_all


# ----------------------------------- forward --------------------------------------
@functools.partial(jax.jit, static_argnames=("compute_dtype",))
def rgcn_forward(adj_flat, feat, w_cat, bias_all, *, compute_dtype=jnp.bfloat16):
    """adj_flat (N, R*N), feat (N, D), w_cat (L, D, R*D), bias_all (L, 1, D)."""
    N, D = feat.shape
    R = adj_flat.shape[1] // N
    L = w_cat.shape[0]

    itemsize = jnp.dtype(compute_dtype).itemsize
    flops = L * (2 * N * D * (R * D) + R * 2 * N * N * D)
    bytes_accessed = ((adj_flat.size + w_cat.size) * itemsize
                      + feat.size * 4 + bias_all.size * 4 + N * D * 4)

    kernel = functools.partial(_rgcn_fused_kernel, L, R, N, D, compute_dtype)

    return pl.pallas_call(
        kernel,
        out_shape=jax.ShapeDtypeStruct((N, D), jnp.float32),
        in_specs=[
            pl.BlockSpec(memory_space=pltpu.MemorySpace.VMEM),   # adj_flat (N, R*N)
            pl.BlockSpec(memory_space=pltpu.MemorySpace.VMEM),   # feat     (N, D)
            pl.BlockSpec(memory_space=pltpu.MemorySpace.VMEM),   # w_cat    (L, D, R*D)
            pl.BlockSpec(memory_space=pltpu.MemorySpace.VMEM),   # bias_all (L, 1, D)
        ],
        out_specs=pl.BlockSpec(memory_space=pltpu.MemorySpace.VMEM),
        cost_estimate=pl.CostEstimate(flops=flops, transcendentals=0,
                                      bytes_accessed=bytes_accessed),
    )(adj_flat, feat, w_cat, bias_all)


# ---------------- pure-JAX reference (mirrors DGL RelGraphConv semantics) --------
def rgcn_reference(adj, feat, params, *, matmul_dtype=None):
    """matmul_dtype=None -> exact f32 module semantics;
       matmul_dtype=bfloat16 -> emulates the kernel's MXU input precision."""
    cast = (lambda x: x) if matmul_dtype is None else (lambda x: x.astype(matmul_dtype))
    h = feat
    L = len(params)
    for i, (wcomp, bases, bias) in enumerate(params):
        w = jnp.einsum('rb,bij->rij', wcomp, bases)                  # basis decomposition
        msg = jnp.einsum('nd,rde->rne', cast(h), cast(w),
                         preferred_element_type=jnp.float32)         # feat[src] @ W_r
        h = jnp.einsum('rvn,rne->ve', cast(adj), cast(msg),
                       preferred_element_type=jnp.float32) + bias    # norm-weighted sum at dst
        if i != L - 1:
            h = jnp.maximum(h, 0.0)
    return h


if __name__ == "__main__":
    knowledge_num = 128      # in_feat == out_feat == number of knowledge nodes
    num_rels = 4
    num_bases = num_rels     # num_bases == -1  ->  num_bases = num_rels
    gcn_layers = 2
    num_nodes = knowledge_num
    num_edges = 512

    key = jax.random.PRNGKey(0)
    k_feat, k_src, k_dst, k_ety, *k_params = jax.random.split(key, 4 + gcn_layers)

    # node features (knowledge-concept embeddings), (N, D)
    feat = jax.random.normal(k_feat, (num_nodes, knowledge_num), jnp.float32)

    # synthetic multi-relational graph
    src = jax.random.randint(k_src, (num_edges,), 0, num_nodes)
    dst = jax.random.randint(k_dst, (num_edges,), 0, num_nodes)
    etype = jax.random.randint(k_ety, (num_edges,), 0, num_rels)
    in_deg = jnp.zeros((num_nodes,), jnp.float32).at[dst].add(1.0)
    norm = 1.0 / jnp.maximum(in_deg[dst], 1.0)               # g.edata['norm'], per edge

    # densify: adj[r, v, u] = sum of norm over edges u->v with relation r
    adj = jnp.zeros((num_rels, num_nodes, num_nodes), jnp.float32)
    adj = adj.at[etype, dst, src].add(norm)

    # deterministic per-layer parameters (basis weights, coefficients, bias)
    params = []
    for i in range(gcn_layers):
        kb, kc = jax.random.split(k_params[i])
        bases = jax.random.normal(kb, (num_bases, knowledge_num, knowledge_num),
                                  jnp.float32) * 0.05
        wcomp = jax.random.normal(kc, (num_rels, num_bases), jnp.float32)
        bias = jnp.zeros((1, knowledge_num), jnp.float32)    # DGL init: zeros
        params.append((wcomp, bases, bias))

    # One-time preprocessing (static graph / fixed params); forward only runs the kernel.
    adj_flat = jax.block_until_ready(prepare_graph(adj))
    w_cat, bias_all = jax.tree_util.tree_map(jax.block_until_ready,
                                             prepare_params(params))

    out = jax.block_until_ready(rgcn_forward(adj_flat, feat, w_cat, bias_all))
    assert out.shape == (num_nodes, knowledge_num)

    # Tight check vs. a reference that uses the same MXU input precision as the kernel
    # (bf16 operands, f32 accumulation).
    ref_mxu = rgcn_reference(adj, feat, params, matmul_dtype=jnp.bfloat16)
    assert jnp.allclose(out, ref_mxu, rtol=5e-3, atol=5e-3), "mismatch vs MXU-precision ref"

    # Looser check vs. exact f32 module semantics; the only difference is bf16
    # rounding of the MXU inputs (incl. degree norms), hence the 1e-1 tolerance.
    # Tightening this requires compute_dtype=f32, not a kernel change.
    ref_f32 = rgcn_reference(adj, feat, params)
    assert jnp.allclose(out, ref_f32, rtol=1e-1, atol=1e-1), "mismatch vs f32 reference"

    print("KERNEL_OK")
</pallas_src>

<mosaic_0001>
module attributes {stable_mosaic.version = 11 : i64} {
  func.func @_rgcn_fused_kernel(%arg0: memref<128x512xbf16, #tpu.memory_space<vmem>>, %arg1: memref<128x128xf32, #tpu.memory_space<vmem>>, %arg2: memref<2x128x512xbf16, #tpu.memory_space<vmem>>, %arg3: memref<2x1x128xf32, #tpu.memory_space<vmem>>, %arg4: memref<128x128xf32, #tpu.memory_space<vmem>>) attributes {dimension_semantics = [], scalar_prefetch = 0 : i64, scratch_operands = 0 : i64, tpu.core_type = #tpu.core_type<tc>} {
    %c0 = arith.constant 0 : index
    %c0_0 = arith.constant 0 : index
    %0 = vector.load %arg1[%c0, %c0_0] : memref<128x128xf32, #tpu.memory_space<vmem>>, vector<128x128xf32>
    %1 = arith.truncf %0 : vector<128x128xf32> to vector<128x128xbf16>
    %c0_1 = arith.constant 0 : index
    %c0_2 = arith.constant 0 : index
    %c0_3 = arith.constant 0 : index
    %2 = vector.load %arg2[%c0_1, %c0_2, %c0_3] : memref<2x128x512xbf16, #tpu.memory_space<vmem>>, vector<1x128x512xbf16>
    %3 = vector.shape_cast %2 : vector<1x128x512xbf16> to vector<128x512xbf16>
    %cst = arith.constant dense<0.000000e+00> : vector<128x512xf32>
    %4 = tpu.matmul %1, %3, %cst {dimension_numbers = #tpu.dot_dimension_numbers<[1], [0], [0], [1], [0, 0, 1, 1], [], []>} : vector<128x128xbf16>, vector<128x512xbf16>, vector<128x512xf32> -> vector<128x512xf32>
    %5 = arith.truncf %4 : vector<128x512xf32> to vector<128x512xbf16>
    %c0_4 = arith.constant 0 : index
    %c0_5 = arith.constant 0 : index
    %6 = vector.load %arg0[%c0_4, %c0_5] : memref<128x512xbf16, #tpu.memory_space<vmem>>, vector<128x128xbf16>
    %7 = vector.extract_strided_slice %5 {offsets = [0, 0], sizes = [128, 128], strides = [1, 1]} : vector<128x512xbf16> to vector<128x128xbf16>
    %cst_6 = arith.constant dense<0.000000e+00> : vector<128x128xf32>
    %8 = tpu.matmul %6, %7, %cst_6 {dimension_numbers = #tpu.dot_dimension_numbers<[1], [0], [0], [1], [0, 0, 1, 1], [], []>} : vector<128x128xbf16>, vector<128x128xbf16>, vector<128x128xf32> -> vector<128x128xf32>
    %c0_7 = arith.constant 0 : index
    %c128 = arith.constant 128 : index
    %9 = vector.load %arg0[%c0_7, %c128] : memref<128x512xbf16, #tpu.memory_space<vmem>>, vector<128x128xbf16>
    %10 = vector.extract_strided_slice %5 {offsets = [0, 128], sizes = [128, 128], strides = [1, 1]} : vector<128x512xbf16> to vector<128x128xbf16>
    %cst_8 = arith.constant dense<0.000000e+00> : vector<128x128xf32>
    %11 = tpu.matmul %9, %10, %cst_8 {dimension_numbers = #tpu.dot_dimension_numbers<[1], [0], [0], [1], [0, 0, 1, 1], [], []>} : vector<128x128xbf16>, vector<128x128xbf16>, vector<128x128xf32> -> vector<128x128xf32>
    %12 = arith.addf %8, %11 : vector<128x128xf32>
    %c0_9 = arith.constant 0 : index
    %c256 = arith.constant 256 : index
    %13 = vector.load %arg0[%c0_9, %c256] : memref<128x512xbf16, #tpu.memory_space<vmem>>, vector<128x128xbf16>
    %14 = vector.extract_strided_slice %5 {offsets = [0, 256], sizes = [128, 128], strides = [1, 1]} : vector<128x512xbf16> to vector<128x128xbf16>
    %cst_10 = arith.constant dense<0.000000e+00> : vector<128x128xf32>
    %15 = tpu.matmul %13, %14, %cst_10 {dimension_numbers = #tpu.dot_dimension_numbers<[1], [0], [0], [1], [0, 0, 1, 1], [], []>} : vector<128x128xbf16>, vector<128x128xbf16>, vector<128x128xf32> -> vector<128x128xf32>
    %16 = arith.addf %12, %15 : vector<128x128xf32>
    %c0_11 = arith.constant 0 : index
    %c384 = arith.constant 384 : index
    %17 = vector.load %arg0[%c0_11, %c384] : memref<128x512xbf16, #tpu.memory_space<vmem>>, vector<128x128xbf16>
    %18 = vector.extract_strided_slice %5 {offsets = [0, 384], sizes = [128, 128], strides = [1, 1]} : vector<128x512xbf16> to vector<128x128xbf16>
    %cst_12 = arith.constant dense<0.000000e+00> : vector<128x128xf32>
    %19 = tpu.matmul %17, %18, %cst_12 {dimension_numbers = #tpu.dot_dimension_numbers<[1], [0], [0], [1], [0, 0, 1, 1], [], []>} : vector<128x128xbf16>, vector<128x128xbf16>, vector<128x128xf32> -> vector<128x128xf32>
    %20 = arith.addf %16, %19 : vector<128x128xf32>
    %c0_13 = arith.constant 0 : index
    %c0_14 = arith.constant 0 : index
    %c0_15 = arith.constant 0 : index
    %21 = vector.load %arg3[%c0_13, %c0_14, %c0_15] : memref<2x1x128xf32, #tpu.memory_space<vmem>>, vector<1x1x128xf32>
    %22 = vector.shape_cast %21 : vector<1x1x128xf32> to vector<1x128xf32>
    %23 = vector.broadcast %22 : vector<1x128xf32> to vector<128x128xf32>
    %24 = arith.addf %20, %23 : vector<128x128xf32>
    %cst_16 = arith.constant 0.000000e+00 : f32
    %25 = vector.broadcast %cst_16 : f32 to vector<128x128xf32>
    %26 = arith.maximumf %24, %25 : vector<128x128xf32>
    %27 = arith.truncf %26 : vector<128x128xf32> to vector<128x128xbf16>
    %c1 = arith.constant 1 : index
    %c0_17 = arith.constant 0 : index
    %c0_18 = arith.constant 0 : index
    %28 = vector.load %arg2[%c1, %c0_17, %c0_18] : memref<2x128x512xbf16, #tpu.memory_space<vmem>>, vector<1x128x512xbf16>
    %29 = vector.shape_cast %28 : vector<1x128x512xbf16> to vector<128x512xbf16>
    %cst_19 = arith.constant dense<0.000000e+00> : vector<128x512xf32>
    %30 = tpu.matmul %27, %29, %cst_19 {dimension_numbers = #tpu.dot_dimension_numbers<[1], [0], [0], [1], [0, 0, 1, 1], [], []>} : vector<128x128xbf16>, vector<128x512xbf16>, vector<128x512xf32> -> vector<128x512xf32>
    %31 = arith.truncf %30 : vector<128x512xf32> to vector<128x512xbf16>
    %c0_20 = arith.constant 0 : index
    %c0_21 = arith.constant 0 : index
    %32 = vector.load %arg0[%c0_20, %c0_21] : memref<128x512xbf16, #tpu.memory_space<vmem>>, vector<128x128xbf16>
    %33 = vector.extract_strided_slice %31 {offsets = [0, 0], sizes = [128, 128], strides = [1, 1]} : vector<128x512xbf16> to vector<128x128xbf16>
    %cst_22 = arith.constant dense<0.000000e+00> : vector<128x128xf32>
    %34 = tpu.matmul %32, %33, %cst_22 {dimension_numbers = #tpu.dot_dimension_numbers<[1], [0], [0], [1], [0, 0, 1, 1], [], []>} : vector<128x128xbf16>, vector<128x128xbf16>, vector<128x128xf32> -> vector<128x128xf32>
    %c0_23 = arith.constant 0 : index
    %c128_24 = arith.constant 128 : index
    %35 = vector.load %arg0[%c0_23, %c128_24] : memref<128x512xbf16, #tpu.memory_space<vmem>>, vector<128x128xbf16>
    %36 = vector.extract_strided_slice %31 {offsets = [0, 128], sizes = [128, 128], strides = [1, 1]} : vector<128x512xbf16> to vector<128x128xbf16>
    %cst_25 = arith.constant dense<0.000000e+00> : vector<128x128xf32>
    %37 = tpu.matmul %35, %36, %cst_25 {dimension_numbers = #tpu.dot_dimension_numbers<[1], [0], [0], [1], [0, 0, 1, 1], [], []>} : vector<128x128xbf16>, vector<128x128xbf16>, vector<128x128xf32> -> vector<128x128xf32>
    %38 = arith.addf %34, %37 : vector<128x128xf32>
    %c0_26 = arith.constant 0 : index
    %c256_27 = arith.constant 256 : index
    %39 = vector.load %arg0[%c0_26, %c256_27] : memref<128x512xbf16, #tpu.memory_space<vmem>>, vector<128x128xbf16>
    %40 = vector.extract_strided_slice %31 {offsets = [0, 256], sizes = [128, 128], strides = [1, 1]} : vector<128x512xbf16> to vector<128x128xbf16>
    %cst_28 = arith.constant dense<0.000000e+00> : vector<128x128xf32>
    %41 = tpu.matmul %39, %40, %cst_28 {dimension_numbers = #tpu.dot_dimension_numbers<[1], [0], [0], [1], [0, 0, 1, 1], [], []>} : vector<128x128xbf16>, vector<128x128xbf16>, vector<128x128xf32> -> vector<128x128xf32>
    %42 = arith.addf %38, %41 : vector<128x128xf32>
    %c0_29 = arith.constant 0 : index
    %c384_30 = arith.constant 384 : index
    %43 = vector.load %arg0[%c0_29, %c384_30] : memref<128x512xbf16, #tpu.memory_space<vmem>>, vector<128x128xbf16>
    %44 = vector.extract_strided_slice %31 {offsets = [0, 384], sizes = [128, 128], strides = [1, 1]} : vector<128x512xbf16> to vector<128x128xbf16>
    %cst_31 = arith.constant dense<0.000000e+00> : vector<128x128xf32>
    %45 = tpu.matmul %43, %44, %cst_31 {dimension_numbers = #tpu.dot_dimension_numbers<[1], [0], [0], [1], [0, 0, 1, 1], [], []>} : vector<128x128xbf16>, vector<128x128xbf16>, vector<128x128xf32> -> vector<128x128xf32>
    %46 = arith.addf %42, %45 : vector<128x128xf32>
    %c1_32 = arith.constant 1 : index
    %c0_33 = arith.constant 0 : index
    %c0_34 = arith.constant 0 : index
    %47 = vector.load %arg3[%c1_32, %c0_33, %c0_34] : memref<2x1x128xf32, #tpu.memory_space<vmem>>, vector<1x1x128xf32>
    %48 = vector.shape_cast %47 : vector<1x1x128xf32> to vector<1x128xf32>
    %49 = vector.broadcast %48 : vector<1x128xf32> to vector<128x128xf32>
    %50 = arith.addf %46, %49 : vector<128x128xf32>
    %c0_35 = arith.constant 0 : index
    %c0_36 = arith.constant 0 : index
    %51 = vector.load %arg4[%c0_35, %c0_36] : memref<128x128xf32, #tpu.memory_space<vmem>>, vector<128x128xf32>
    tpu.vector_store %arg4[%c0_35, %c0_36], %50 {strides = array<i32>} : memref<128x128xf32, #tpu.memory_space<vmem>>, vector<128x128xf32>,
    return
  }
}

</mosaic_0001>

<bundles_post_ra>
// kernel: rgcn_forward.1
= control target key start
LH: loop header
LB: loop body
LE: loop exit
PB: predicated region body
PF: predicated region fallthrough
CT: control target
= control target key end

     0   :  { %9 = vsyncpa [#allocation3], 0  ;;  %s3368_s0 = inlined_call_operand.hbm [shape: bf16[128,512], index: 0, kind: input, shape index: {}]   ;;  %s3369_s1 = inlined_call_operand.hbm [shape: f32[128,128], index: 1, kind: input, shape index: {}]   ;;  %s3370_s2 = inlined_call_operand.hbm [shape: bf16[2,128,512], index: 2, kind: input, shape index: {}]   ;;  %s3371_s3 = inlined_call_operand.vmem [shape: f32[2,1,128], index: 3, kind: input, shape index: {}]   ;;  %s3372_s4 = inlined_call_operand.hbm [shape: f32[128,128], index: 4, kind: output, shape index: {}]  }
   0x1   :  { %10 = vsyncpa [#allocation6], 0 }
   0x2   :  { %11 = vsyncpa [#allocation4], 0  ;;  %s2996_s15 = smov [#allocation5]   ;;  %s2902_s19 = scalar_lea.hbm %s3369_s1, 2048 }
   0x3   :  { %s29_s16 = sshll.u32 %s2996_s15, 4  ;;  %p2903_p0 = scmp.ne.s32.totalorder %s3369_s1, %s2902_s19  ;;  %s30_s16 = int_to_ptr.vmem [resolvable:$true] %s29_s16 }
   0x4   :  { %p2906_p1 = scmp.lt.u32.totalorder %s2902_s19, %s3369_s1 }
   0x6   :  { %p2908_p2 = pnand %p2906_p1, %p2903_p0 }
   0x8   :  { %2911 = shalt.err (!%p2908_p2)
}
   0x9   :  { %s2912_s24 = scalar_lea.vmem %s30_s16, 2048  ;;  %p2917_p4 = scmp.lt.s32.totalorder %s30_s16, %s30_s16 }
   0xa   :  { %p2913_p3 = scmp.ne.s32.totalorder %s30_s16, %s2912_s24  ;;  %p2918_p5 = scmp.lt.s32.totalorder %s2912_s24, %s2912_s24 }
   0xc   :  { %p2919_p6 = por %p2918_p5, %p2917_p4 }
   0xe   :  { %p2920_p7 = pnand %p2919_p6, %p2913_p3 }
  0x10   :  { %2923 = shalt.err (!%p2920_p7)
}
  0x11   :  { %s2997_s25 = smov 128   ;;  %s2998_s26 = smov 8  }
  0x12   :  { %35 = dma.hbm_to_vmem [thread:$0]  %s3369_s1, 2048, %s30_s16, [#allocation6], %s2997_s25, %s2997_s25, %s2998_s26  }
  0x13   :  { %s2999_s29 = smov [#allocation2]   ;;  %s2924_s7 = scalar_lea.hbm %s3368_s0, 4096 }
  0x14   :  { %s17_s30 = sshll.u32 %s2999_s29, 4  ;;  %p2925_p8 = scmp.ne.s32.totalorder %s3368_s0, %s2924_s7  ;;  %s18_s30 = int_to_ptr.vmem [resolvable:$true] %s17_s30 }
  0x15   :  { %p2928_p9 = scmp.lt.u32.totalorder %s2924_s7, %s3368_s0 }
  0x17   :  { %p2930_p10 = pnand %p2928_p9, %p2925_p8 }
  0x19   :  { %2933 = shalt.err (!%p2930_p10)
}
  0x1a   :  { %s2934_s12 = scalar_lea.vmem %s18_s30, 4096  ;;  %p2939_p12 = scmp.lt.s32.totalorder %s18_s30, %s18_s30 }
  0x1b   :  { %p2935_p11 = scmp.ne.s32.totalorder %s18_s30, %s2934_s12  ;;  %p2940_p13 = scmp.lt.s32.totalorder %s2934_s12, %s2934_s12 }
  0x1d   :  { %p2941_p0 = por %p2940_p13, %p2939_p12 }
  0x1f   :  { %p2942_p1 = pnand %p2941_p0, %p2935_p11 }
  0x21   :  { %2945 = shalt.err (!%p2942_p1)
}
  0x22   :  { %s3000_s1 = smov 256   ;;  %s3001_s13 = smov 16  }
  0x23   :  { %23 = dma.hbm_to_vmem [thread:$0]  %s3368_s0, 4096, %s18_s30, [#allocation3], %s3000_s1, %s3000_s1, %s3001_s13  }
  0x24   :  { %s3002_s16 = smov [#allocation7]   ;;  %s2946_s20 = scalar_lea.hbm %s3370_s2, 8192 }
  0x25   :  { %s41_s17 = sshll.u32 %s3002_s16, 4  ;;  %p2947_p2 = scmp.ne.s32.totalorder %s3370_s2, %s2946_s20  ;;  %s42_s17 = int_to_ptr.vmem [resolvable:$true] %s41_s17 }
  0x26   :  { %p2950_p3 = scmp.lt.u32.totalorder %s2946_s20, %s3370_s2 }
  0x28   :  { %p2952_p4 = pnand %p2950_p3, %p2947_p2 }
  0x2a   :  { %2955 = shalt.err (!%p2952_p4)
}
  0x2b   :  { %s2956_s27 = scalar_lea.vmem %s42_s17, 8192  ;;  %p2961_p6 = scmp.lt.s32.totalorder %s42_s17, %s42_s17 }
  0x2c   :  { %p2957_p5 = scmp.ne.s32.totalorder %s42_s17, %s2956_s27  ;;  %p2962_p7 = scmp.lt.s32.totalorder %s2956_s27, %s2956_s27 }
  0x2e   :  { %p2963_p8 = por %p2962_p7, %p2961_p6 }
  0x30   :  { %p2964_p9 = pnand %p2963_p8, %p2957_p5 }
  0x32   :  { %2967 = shalt.err (!%p2964_p9)
}
  0x33   :  { %47 = dma.hbm_to_vmem [thread:$0]  %s3370_s2, 8192, %s42_s17, [#allocation6], %s3000_s1, %s3000_s1, %s3001_s13  }
  0x34   :  { %2990 = dma.done.wait [#allocation3], 4096  }
  0x35   :  { %2991 = vsyncadd [#allocation3], 4294963200 }
  0x36   :  { %2992 = dma.done.wait [#allocation6], 10240  }
  0x37   :  { %2993 = vsyncadd [#allocation6], 4294957056  ;;  %v3003_v0 = vmov 0   ;;  %v2774_v1 = vld [vmem:[#allocation7 + $0x4] ss:$16 sps:$4 sm:$0xff]   ;;  %v61_v18 = vld [vmem:[#allocation5 + $0x8] sm:$0xff] }
  0x38   :  { %308 = vmatprep.mubr.bf16.mxu1 %v3003_v0  ;;  %v2776_v2 = vld [vmem:[#allocation7] ss:$16 sps:$4 sm:$0xff]   ;;  %276 = vmatprep.subr.bf16.mxu1 %v2774_v1  ;;  %v2777_v3 = vld [vmem:[#allocation7 + $0x24] ss:$16 sps:$4 sm:$0xff]   ;;  %v2800_v19 = vld [vmem:[#allocation7 + $0xc] ss:$16 sps:$4 sm:$0xff]  }
  0x39   :  { %277 = vmatpush1.bf16.msra.mxu1 %v2776_v2  ;;  %v2779_v4 = vld [vmem:[#allocation7 + $0x20] ss:$16 sps:$4 sm:$0xff]   ;;  %v2780_v5 = vld [vmem:[#allocation7 + $0x44] ss:$16 sps:$4 sm:$0xff]   ;;  %v2798_v20 = vld [vmem:[#allocation7 + $0x8] ss:$16 sps:$4 sm:$0xff]  }
  0x3a   :  { %278 = vmatprep.subr.bf16.mxu1 %v2777_v3  ;;  %v2782_v6 = vld [vmem:[#allocation7 + $0x40] ss:$16 sps:$4 sm:$0xff]   ;;  %v2783_v7 = vld [vmem:[#allocation7 + $0x64] ss:$16 sps:$4 sm:$0xff]   ;;  %v2803_v22 = vld [vmem:[#allocation7 + $0x2c] ss:$16 sps:$4 sm:$0xff]  }
  0x3b   :  { %v2785_v8 = vld [vmem:[#allocation7 + $0x60] ss:$16 sps:$4 sm:$0xff]   ;;  %v2786_v9 = vld [vmem:[#allocation7 + $0x84] ss:$16 sps:$4 sm:$0xff]   ;;  %v63_v24 = vld [vmem:[#allocation5 + $0x18] sm:$0xff] }
  0x3c   :  { %v2788_v10 = vld [vmem:[#allocation7 + $0x80] ss:$16 sps:$4 sm:$0xff]   ;;  %v2789_v11 = vld [vmem:[#allocation7 + $0xa4] ss:$16 sps:$4 sm:$0xff]   ;;  %v2801_v25 = vld [vmem:[#allocation7 + $0x28] ss:$16 sps:$4 sm:$0xff]  }
  0x3d   :  { %279 = vmatpush1.bf16.msra.mxu1 %v2779_v4  ;;  %v2791_v12 = vld [vmem:[#allocation7 + $0xa0] ss:$16 sps:$4 sm:$0xff]   ;;  %v2792_v13 = vld [vmem:[#allocation7 + $0xc4] ss:$16 sps:$4 sm:$0xff]   ;;  %v2806_v26 = vld [vmem:[#allocation7 + $0x4c] ss:$16 sps:$4 sm:$0xff]  }
  0x3e   :  { %280 = vmatprep.subr.bf16.mxu1 %v2780_v5  ;;  %v2794_v14 = vld [vmem:[#allocation7 + $0xc0] ss:$16 sps:$4 sm:$0xff]   ;;  %v2795_v15 = vld [vmem:[#allocation7 + $0xe4] ss:$16 sps:$4 sm:$0xff]   ;;  %v2804_v27 = vld [vmem:[#allocation7 + $0x48] ss:$16 sps:$4 sm:$0xff]  }
  0x3f   :  { %v2797_v16 = vld [vmem:[#allocation7 + $0xe0] ss:$16 sps:$4 sm:$0xff]   ;;  %v2809_v29 = vld [vmem:[#allocation7 + $0x6c] ss:$16 sps:$4 sm:$0xff]   ;;  %v2807_v32 = vld [vmem:[#allocation7 + $0x68] ss:$16 sps:$4 sm:$0xff]  }
  0x40   :  { %v60_v17 = vld [vmem:[#allocation5] sm:$0xff]  ;;  %v62_v23 = vld [vmem:[#allocation5 + $0x10] sm:$0xff]  ;;  %v65_v31 = vld [vmem:[#allocation5 + $0x28] sm:$0xff] }
  0x41   :  { %281 = vmatpush1.bf16.msra.mxu1 %v2782_v6  ;;  %v3070_v21 = vpack.c.bf16 %v61_v18, %v60_v17  ;;  %v77_v28 = vpack.c.bf16 %v63_v24, %v62_v23  ;;  %v64_v30 = vld [vmem:[#allocation5 + $0x20] sm:$0xff]  ;;  %v2812_v33 = vld [vmem:[#allocation7 + $0x8c] ss:$16 sps:$4 sm:$0xff]   ;;  %v2810_v34 = vld [vmem:[#allocation7 + $0x88] ss:$16 sps:$4 sm:$0xff]  }
  0x42   :  { %282 = vmatprep.subr.bf16.mxu1 %v2783_v7  ;;  %v78_v35 = vpack.c.bf16 %v65_v31, %v64_v30  ;;  %v2815_v36 = vld [vmem:[#allocation7 + $0xac] ss:$16 sps:$4 sm:$0xff]   ;;  %v66_v37 = vld [vmem:[#allocation5 + $0x30] sm:$0xff]  ;;  %v2813_v39 = vld [vmem:[#allocation7 + $0xa8] ss:$16 sps:$4 sm:$0xff]  }
  0x43   :  { %v67_v38 = vld [vmem:[#allocation5 + $0x38] sm:$0xff]  ;;  %v68_v44 = vld [vmem:[#allocation5 + $0x40] sm:$0xff]  ;;  %v69_v45 = vld [vmem:[#allocation5 + $0x48] sm:$0xff] }
  0x44   :  { %v2818_v40 = vld [vmem:[#allocation7 + $0xcc] ss:$16 sps:$4 sm:$0xff]   ;;  %v2816_v41 = vld [vmem:[#allocation7 + $0xc8] ss:$16 sps:$4 sm:$0xff]   ;;  %v79_v42 = vpack.c.bf16 %v67_v38, %v66_v37  ;;  %v80_v47 = vpack.c.bf16 %v69_v45, %v68_v44  ;;  %v70_v48 = vld [vmem:[#allocation5 + $0x50] sm:$0xff] }
  0x45   :  { %283 = vmatpush1.bf16.msra.mxu1 %v2785_v8  ;;  %v2821_v43 = vld [vmem:[#allocation7 + $0xec] ss:$16 sps:$4 sm:$0xff]   ;;  %v2819_v46 = vld [vmem:[#allocation7 + $0xe8] ss:$16 sps:$4 sm:$0xff]   ;;  %v72_v51 = vld [vmem:[#allocation5 + $0x60] sm:$0xff] }
  0x46   :  { %284 = vmatprep.subr.bf16.mxu1 %v2786_v9  ;;  %v71_v49 = vld [vmem:[#allocation5 + $0x58] sm:$0xff]  ;;  %v73_v52 = vld [vmem:[#allocation5 + $0x68] sm:$0xff]  ;;  %v74_v54 = vld [vmem:[#allocation5 + $0x70] sm:$0xff] }
  0x47   :  { %v81_v50 = vpack.c.bf16 %v71_v49, %v70_v48  ;;  %v82_v53 = vpack.c.bf16 %v73_v52, %v72_v51  ;;  %v75_v55 = vld [vmem:[#allocation5 + $0x78] sm:$0xff]  ;;  %v3090_v57 = vld [vmem:[#allocation2 + $0x4] ss:$16 sps:$4 sm:$0xff]   ;;  %v2860_v52 = vld [vmem:[#allocation7 + $0x140] ss:$16 sps:$4 sm:$0xff]  }
  0x48   :  { %v83_v56 = vpack.c.bf16 %v75_v55, %v74_v54  ;;  %2429 = vmatprep.mubr.bf16.mxu0 %v3090_v57  ;;  %v2859_v44 = vld [vmem:[#allocation7 + $0x124] ss:$16 sps:$4 sm:$0xff]  }
  0x49   :  { %285 = vmatpush1.bf16.msra.mxu1 %v2788_v10  ;;  %v2862_v48 = vld [vmem:[#allocation7 + $0x144] ss:$16 sps:$4 sm:$0xff]  }
  0x4a   :  { %286 = vmatprep.subr.bf16.mxu1 %v2789_v11  ;;  %v3111_v49 = vld [vmem:[#allocation2 + $0x44] ss:$16 sps:$4 sm:$0xff]  }
  0x4b   :  { %v2865_v54 = vld [vmem:[#allocation7 + $0x164] ss:$16 sps:$4 sm:$0xff]  }
  0x4d   :  { %287 = vmatpush1.bf16.msra.mxu1 %v2791_v12 }
  0x4e   :  { %288 = vmatprep.subr.bf16.mxu1 %v2792_v13 }
  0x51   :  { %289 = vmatpush1.bf16.msra.mxu1 %v2794_v14 }
  0x52   :  { %290 = vmatprep.subr.bf16.mxu1 %v2795_v15 }
  0x55   :  { %291 = vmatpush1.bf16.msra.mxu1 %v2797_v16 }
  0x56   :  { %389 = vmatprep.subr.bf16.mxu1 %v2800_v19 }
  0x58   :  { %309 = vmatmul.mubr.bf16.vlgmr.msra.gmra.mrb[0].mxu1 %v3070_v21 }
  0x59   :  { %390 = vmatpush1.bf16.msra.mxu1 %v2798_v20  ;;  %318 = vmatprep.mubr.bf16.mxu1 %v3003_v0 }
  0x5a   :  { %391 = vmatprep.subr.bf16.mxu1 %v2803_v22 }
  0x5d   :  { %392 = vmatpush1.bf16.msra.mxu1 %v2801_v25 }
  0x5e   :  { %393 = vmatprep.subr.bf16.mxu1 %v2806_v26 }
  0x60   :  { %319 = vmatmul.mubr.bf16.gmra.mrb[4].mxu1 %v77_v28 }
  0x61   :  { %328 = vmatprep.mubr.bf16.mxu1 %v3003_v0  ;;  %394 = vmatpush1.bf16.msra.mxu1 %v2804_v27 }
  0x62   :  { %395 = vmatprep.subr.bf16.mxu1 %v2809_v29 }
  0x65   :  { %396 = vmatpush1.bf16.msra.mxu1 %v2807_v32 }
  0x66   :  { %397 = vmatprep.subr.bf16.mxu1 %v2812_v33 }
  0x68   :  { %329 = vmatmul.mubr.bf16.gmra.mrb[8].mxu1 %v78_v35 }
  0x69   :  { %338 = vmatprep.mubr.bf16.mxu1 %v3003_v0  ;;  %398 = vmatpush1.bf16.msra.mxu1 %v2810_v34 }
  0x6a   :  { %399 = vmatprep.subr.bf16.mxu1 %v2815_v36 }
  0x6d   :  { %400 = vmatpush1.bf16.msra.mxu1 %v2813_v39 }
  0x6e   :  { %401 = vmatprep.subr.bf16.mxu1 %v2818_v40  ;;  %v2854_v40 = vld [vmem:[#allocation7 + $0x100] ss:$16 sps:$4 sm:$0xff]  }
  0x70   :  { %339 = vmatmul.mubr.bf16.gmra.mrb[12].mxu1 %v79_v42 }
  0x71   :  { %348 = vmatprep.mubr.bf16.mxu1 %v3003_v0  ;;  %402 = vmatpush1.bf16.msra.mxu1 %v2816_v41  ;;  %v2856_v41 = vld [vmem:[#allocation7 + $0x104] ss:$16 sps:$4 sm:$0xff]  }
  0x72   :  { %403 = vmatprep.subr.bf16.mxu1 %v2821_v43 }
  0x75   :  { %404 = vmatpush1.bf16.msra.mxu1 %v2819_v46  ;;  %v2857_v46 = vld [vmem:[#allocation7 + $0x120] ss:$16 sps:$4 sm:$0xff]  }
  0x76   :  { %1450 = vmatprep.subr.bf16.mxu1 %v2856_v41 }
  0x78   :  { %349 = vmatmul.mubr.bf16.gmra.mrb[16].mxu1 %v80_v47 }
  0x79   :  { %358 = vmatprep.mubr.bf16.mxu1 %v3003_v0 }
  0x80   :  { %359 = vmatmul.mubr.bf16.gmra.mrb[20].mxu1 %v81_v50 }
  0x81   :  { %368 = vmatprep.mubr.bf16.mxu1 %v3003_v0 }
  0x88   :  { %369 = vmatmul.mubr.bf16.gmra.mrb[24].mxu1 %v82_v53 }
  0x89   :  { %378 = vmatprep.mubr.bf16.mxu1 %v3003_v0 }
  0x90   :  { %379 = vmatmul.mubr.bf16.gmra.mrb[28].mxu1 %v83_v56 }
  0x91   :  { %421 = vmatprep.mubr.bf16.mxu1 %v3003_v0 }
  0x98   :  { %422 = vmatmul.mubr.bf16.vlgmr.msra.gmra.mrb[32].mxu1 %v3070_v21 }
  0x99   :  { %431 = vmatprep.mubr.bf16.mxu1 %v3003_v0  ;;  %1451 = vmatpush1.bf16.msra.mxu1 %v2854_v40 }
  0x9a   :  { %1452 = vmatprep.subr.bf16.mxu1 %v2859_v44  ;;  %v3177_v44 = vld [vmem:[#allocation2 + $0xc0] ss:$16 sps:$4 sm:$0xff]  }
  0x9d   :  { %1453 = vmatpush1.bf16.msra.mxu1 %v2857_v46 }
  0x9e   :  { %1454 = vmatprep.subr.bf16.mxu1 %v2862_v48 }
  0xa0   :  { %432 = vmatmul.mubr.bf16.gmra.mrb[36].mxu1 %v77_v28 }
  0xa1   :  { %441 = vmatprep.mubr.bf16.mxu1 %v3003_v0  ;;  %1455 = vmatpush1.bf16.msra.mxu1 %v2860_v52 }
  0xa2   :  { %1456 = vmatprep.subr.bf16.mxu1 %v2865_v54  ;;  %v3183_v54 = vld [vmem:[#allocation2 + $0x8] ss:$16 sps:$4 sm:$0xff]  }
  0xa8   :  { %442 = vmatmul.mubr.bf16.gmra.mrb[40].mxu1 %v78_v35 }
  0xa9   :  { %451 = vmatprep.mubr.bf16.mxu1 %v3003_v0 }
  0xb0   :  { %452 = vmatmul.mubr.bf16.gmra.mrb[44].mxu1 %v79_v42 }
  0xb1   :  { %461 = vmatprep.mubr.bf16.mxu1 %v3003_v0 }
  0xb8   :  { %462 = vmatmul.mubr.bf16.gmra.mrb[48].mxu1 %v80_v47  ;;  %v3109_v47 = vld [vmem:[#allocation2 + $0x24] ss:$16 sps:$4 sm:$0xff]  }
  0xb9   :  { %471 = vmatprep.mubr.bf16.mxu1 %v3003_v0 }
  0xc0   :  { %472 = vmatmul.mubr.bf16.gmra.mrb[52].mxu1 %v81_v50 }
  0xc1   :  { %481 = vmatprep.mubr.bf16.mxu1 %v3003_v0 }
  0xc8   :  { %482 = vmatmul.mubr.bf16.gmra.mrb[56].mxu1 %v82_v53 }
  0xc9   :  { %491 = vmatprep.mubr.bf16.mxu1 %v3003_v0 }
  0xd0   :  { %492 = vmatmul.mubr.bf16.gmra.mrb[60].mxu1 %v83_v56 }
  0xd1   :  { %1482 = vmatprep.mubr.bf16.mxu1 %v3003_v0 }
 0x12b   :  { %v310_v58 = vpop.f32.mrb[0].mxu1 }
 0x12c   :  { %v312_v59 = vpop.f32.mrb[1].mxu1 }
 0x12d   :  { %v314_v60 = vpop.f32.mrb[2].mxu1 }
 0x12e   :  { %v3093_v61 = vpack.c.bf16 %v314_v60, %v310_v58  ;;  %v316_v62 = vpop.f32.mrb[3].mxu1  ;;  %v3122_v60 = vld [vmem:[#allocation2 + $0x64] ss:$16 sps:$4 sm:$0xff]  }
 0x12f   :  { %v503_v63 = vpack.c.bf16 %v316_v62, %v312_v59  ;;  %v2863_v59 = vld [vmem:[#allocation7 + $0x160] ss:$16 sps:$4 sm:$0xff]   ;;  %v2868_v62 = vld [vmem:[#allocation7 + $0x184] ss:$16 sps:$4 sm:$0xff]  }
 0x130   :  { %1457 = vmatpush1.bf16.msra.mxu1 %v2863_v59 }
 0x131   :  { %2413 = vmatprep.subr.bf16.mxu0 %v503_v63  ;;  %1458 = vmatprep.subr.bf16.mxu1 %v2868_v62 }
 0x132   :  { %2414 = vmatpush3.bf16.msra.mxu0 %v503_v63  ;;  %v3125_v63 = vld [vmem:[#allocation2 + $0x84] ss:$16 sps:$4 sm:$0xff]  }
 0x133   :  { %v320_v1 = vpop.f32.mrb[4].mxu1 }
 0x134   :  { %v322_v2 = vpop.f32.mrb[5].mxu1 }
 0x135   :  { %v324_v3 = vpop.f32.mrb[6].mxu1 }
 0x136   :  { %v3095_v4 = vpack.c.bf16 %v324_v3, %v320_v1  ;;  %v326_v5 = vpop.f32.mrb[7].mxu1 }
 0x137   :  { %v507_v6 = vpack.c.bf16 %v326_v5, %v322_v2  ;;  %v2866_v2 = vld [vmem:[#allocation7 + $0x180] ss:$16 sps:$4 sm:$0xff]   ;;  %v2871_v5 = vld [vmem:[#allocation7 + $0x1a4] ss:$16 sps:$4 sm:$0xff]  }
 0x138   :  { %1459 = vmatpush1.bf16.msra.mxu1 %v2866_v2  ;;  %v3187_v2 = vld [vmem:[#allocation2 + $0x28] ss:$16 sps:$4 sm:$0xff]  }
 0x139   :  { %2415 = vmatprep.subr.bf16.mxu0 %v507_v6  ;;  %1460 = vmatprep.subr.bf16.mxu1 %v2871_v5  ;;  %v3196_v5 = vld [vmem:[#allocation2 + $0x68] ss:$16 sps:$4 sm:$0xff]  }
 0x13a   :  { %2416 = vmatpush3.bf16.msra.mxu0 %v507_v6 }
 0x13b   :  { %v330_v7 = vpop.f32.mrb[8].mxu1 }
 0x13c   :  { %v332_v8 = vpop.f32.mrb[9].mxu1 }
 0x13d   :  { %v334_v9 = vpop.f32.mrb[10].mxu1 }
 0x13e   :  { %v3097_v10 = vpack.c.bf16 %v334_v9, %v330_v7  ;;  %v336_v11 = vpop.f32.mrb[11].mxu1  ;;  %v3134_v9 = vld [vmem:[#allocation2 + $0xa4] ss:$16 sps:$4 sm:$0xff]  }
 0x13f   :  { %v511_v12 = vpack.c.bf16 %v336_v11, %v332_v8  ;;  %v2869_v8 = vld [vmem:[#allocation7 + $0x1a0] ss:$16 sps:$4 sm:$0xff]   ;;  %v2874_v11 = vld [vmem:[#allocation7 + $0x1c4] ss:$16 sps:$4 sm:$0xff]  }
 0x140   :  { %1461 = vmatpush1.bf16.msra.mxu1 %v2869_v8  ;;  %v3217_v8 = vld [vmem:[#allocation2 + $0xc] ss:$16 sps:$4 sm:$0xff]  }
 0x141   :  { %2417 = vmatprep.subr.bf16.mxu0 %v511_v12  ;;  %1462 = vmatprep.subr.bf16.mxu1 %v2874_v11  ;;  %v3221_v11 = vld [vmem:[#allocation2 + $0x2c] ss:$16 sps:$4 sm:$0xff]  }
 0x142   :  { %2418 = vmatpush3.bf16.msra.mxu0 %v511_v12  ;;  %v3137_v12 = vld [vmem:[#allocation2 + $0xc4] ss:$16 sps:$4 sm:$0xff]  }
 0x143   :  { %v340_v13 = vpop.f32.mrb[12].mxu1 }
 0x144   :  { %v342_v14 = vpop.f32.mrb[13].mxu1 }
 0x145   :  { %v344_v15 = vpop.f32.mrb[14].mxu1 }
 0x146   :  { %v3099_v16 = vpack.c.bf16 %v344_v15, %v340_v13  ;;  %v346_v17 = vpop.f32.mrb[15].mxu1 }
 0x147   :  { %v515_v18 = vpack.c.bf16 %v346_v17, %v342_v14  ;;  %v2872_v14 = vld [vmem:[#allocation7 + $0x1c0] ss:$16 sps:$4 sm:$0xff]  }
 0x148   :  { %1463 = vmatpush1.bf16.msra.mxu1 %v2872_v14  ;;  %v3229_v14 = vld [vmem:[#allocation2 + $0x8c] ss:$16 sps:$4 sm:$0xff]  }
 0x149   :  { %2419 = vmatprep.subr.bf16.mxu0 %v515_v18 }
 0x14a   :  { %2420 = vmatpush3.bf16.msra.mxu0 %v515_v18 }
 0x14b   :  { %v350_v19 = vpop.f32.mrb[16].mxu1 }
 0x14c   :  { %v352_v20 = vpop.f32.mrb[17].mxu1 }
 0x14d   :  { %v354_v21 = vpop.f32.mrb[18].mxu1 }
 0x14e   :  { %v3101_v22 = vpack.c.bf16 %v354_v21, %v350_v19  ;;  %v356_v23 = vpop.f32.mrb[19].mxu1 }
 0x14f   :  { %v519_v24 = vpack.c.bf16 %v356_v23, %v352_v20  ;;  %v3149_v20 = vld [vmem:[#allocation2] ss:$16 sps:$4 sm:$0xff]  }
 0x151   :  { %2421 = vmatprep.subr.bf16.mxu0 %v519_v24 }
 0x152   :  { %2422 = vmatpush3.bf16.msra.mxu0 %v519_v24 }
 0x153   :  { %v360_v25 = vpop.f32.mrb[20].mxu1 }
 0x154   :  { %v362_v26 = vpop.f32.mrb[21].mxu1 }
 0x155   :  { %v364_v27 = vpop.f32.mrb[22].mxu1 }
 0x156   :  { %v3103_v28 = vpack.c.bf16 %v364_v27, %v360_v25  ;;  %v366_v29 = vpop.f32.mrb[23].mxu1  ;;  %v3158_v27 = vld [vmem:[#allocation2 + $0x20] ss:$16 sps:$4 sm:$0xff]  }
 0x157   :  { %v523_v30 = vpack.c.bf16 %v366_v29, %v362_v26 }
 0x159   :  { %2423 = vmatprep.subr.bf16.mxu0 %v523_v30 }
 0x15a   :  { %2424 = vmatpush3.bf16.msra.mxu0 %v523_v30 }
 0x15b   :  { %v370_v31 = vpop.f32.mrb[24].mxu1 }
 0x15c   :  { %v372_v32 = vpop.f32.mrb[25].mxu1 }
 0x15d   :  { %v374_v33 = vpop.f32.mrb[26].mxu1 }
 0x15e   :  { %v3105_v34 = vpack.c.bf16 %v374_v33, %v370_v31  ;;  %v376_v35 = vpop.f32.mrb[27].mxu1 }
 0x15f   :  { %v527_v36 = vpack.c.bf16 %v376_v35, %v372_v32  ;;  %v3169_v35 = vld [vmem:[#allocation2 + $0x60] ss:$16 sps:$4 sm:$0xff]  }
 0x161   :  { %2425 = vmatprep.subr.bf16.mxu0 %v527_v36 }
 0x162   :  { %2426 = vmatpush3.bf16.msra.mxu0 %v527_v36  ;;  %v3171_v36 = vld [vmem:[#allocation2 + $0x80] ss:$16 sps:$4 sm:$0xff]  }
 0x163   :  { %v380_v37 = vpop.f32.mrb[28].mxu1 }
 0x164   :  { %v382_v38 = vpop.f32.mrb[29].mxu1 }
 0x165   :  { %v384_v39 = vpop.f32.mrb[30].mxu1 }
 0x166   :  { %v3107_v42 = vpack.c.bf16 %v384_v39, %v380_v37  ;;  %v386_v43 = vpop.f32.mrb[31].mxu1 }
 0x167   :  { %v531_v45 = vpack.c.bf16 %v386_v43, %v382_v38  ;;  %v3175_v43 = vld [vmem:[#allocation2 + $0xa0] ss:$16 sps:$4 sm:$0xff]  }
 0x169   :  { %2427 = vmatprep.subr.bf16.mxu0 %v531_v45 }
 0x16a   :  { %2428 = vmatpush3.bf16.msra.mxu0 %v531_v45 }
 0x16b   :  { %v423_v50 = vpop.f32.mrb[32].mxu1  ;;  %2445 = vmatprep.subr.bf16.mxu0 %v3093_v61 }
 0x16c   :  { %v425_v51 = vpop.f32.mrb[33].mxu1 }
 0x16d   :  { %v427_v53 = vpop.f32.mrb[34].mxu1  ;;  %2430 = vmatmul.mubr.bf16.vlgmr.msra.gmra.mrb[0].mxu0 %v3109_v47 }
 0x16e   :  { %v3115_v55 = vpack.c.bf16 %v427_v53, %v423_v50  ;;  %v429_v56 = vpop.f32.mrb[35].mxu1  ;;  %2446 = vmatpush3.bf16.msra.mxu0 %v3093_v61  ;;  %2433 = vmatprep.mubr.bf16.mxu0 %v3111_v49  ;;  %v3181_v53 = vld [vmem:[#allocation2 + $0xe0] ss:$16 sps:$4 sm:$0xff]  }
 0x16f   :  { %v3119_v58 = vpack.c.bf16 %v429_v56, %v425_v51  ;;  %2447 = vmatprep.subr.bf16.mxu0 %v3095_v4 }
 0x172   :  { %2448 = vmatpush3.bf16.msra.mxu0 %v3095_v4 }
 0x173   :  { %v433_v1 = vpop.f32.mrb[36].mxu1  ;;  %2449 = vmatprep.subr.bf16.mxu0 %v3097_v10 }
 0x174   :  { %v435_v61 = vpop.f32.mrb[37].mxu1 }
 0x175   :  { %v437_v3 = vpop.f32.mrb[38].mxu1  ;;  %2434 = vmatmul.mubr.bf16.gmra.mrb[4].mxu0 %v3122_v60 }
 0x176   :  { %v508_v6 = vpack.c.bf16 %v437_v3, %v433_v1  ;;  %v439_v7 = vpop.f32.mrb[39].mxu1  ;;  %2450 = vmatpush3.bf16.msra.mxu0 %v3097_v10  ;;  %2437 = vmatprep.mubr.bf16.mxu0 %v3125_v63  ;;  %v3189_v3 = vld [vmem:[#allocation2 + $0x48] ss:$16 sps:$4 sm:$0xff]  }
 0x177   :  { %v3131_v4 = vpack.c.bf16 %v439_v7, %v435_v61  ;;  %2451 = vmatprep.subr.bf16.mxu0 %v3099_v16  ;;  %v3209_v7 = vld [vmem:[#allocation2 + $0xc8] ss:$16 sps:$4 sm:$0xff]  }
 0x17a   :  { %2452 = vmatpush3.bf16.msra.mxu0 %v3099_v16  ;;  %v3146_v16 = vld [vmem:[#allocation2 + $0xe4] ss:$16 sps:$4 sm:$0xff]  }
 0x17b   :  { %v443_v13 = vpop.f32.mrb[40].mxu1  ;;  %2453 = vmatprep.subr.bf16.mxu0 %v3101_v22 }
 0x17c   :  { %v445_v10 = vpop.f32.mrb[41].mxu1 }
 0x17d   :  { %v447_v15 = vpop.f32.mrb[42].mxu1  ;;  %2438 = vmatmul.mubr.bf16.gmra.mrb[8].mxu0 %v3134_v9 }
 0x17e   :  { %v512_v17 = vpack.c.bf16 %v447_v15, %v443_v13  ;;  %v449_v18 = vpop.f32.mrb[43].mxu1  ;;  %2454 = vmatpush3.bf16.msra.mxu0 %v3101_v22  ;;  %2441 = vmatprep.mubr.bf16.mxu0 %v3137_v12  ;;  %v3223_v13 = vld [vmem:[#allocation2 + $0x4c] ss:$16 sps:$4 sm:$0xff]  }
 0x17f   :  { %v3143_v19 = vpack.c.bf16 %v449_v18, %v445_v10  ;;  %2455 = vmatprep.subr.bf16.mxu0 %v3103_v28  ;;  %v3227_v10 = vld [vmem:[#allocation2 + $0x6c] ss:$16 sps:$4 sm:$0xff]  }
 0x180   :  { %v3233_v15 = vld [vmem:[#allocation2 + $0xac] ss:$16 sps:$4 sm:$0xff]  }
 0x181   :  { %v3239_v18 = vld [vmem:[#allocation2 + $0xec] ss:$16 sps:$4 sm:$0xff]  }
 0x182   :  { %2456 = vmatpush3.bf16.msra.mxu0 %v3103_v28  ;;  %v3161_v28 = vld [vmem:[#allocation2 + $0x40] ss:$16 sps:$4 sm:$0xff]  }
 0x183   :  { %v453_v21 = vpop.f32.mrb[44].mxu1  ;;  %2457 = vmatprep.subr.bf16.mxu0 %v3105_v34 }
 0x184   :  { %v455_v23 = vpop.f32.mrb[45].mxu1 }
 0x185   :  { %v457_v24 = vpop.f32.mrb[46].mxu1  ;;  %2442 = vmatmul.mubr.bf16.gmra.mrb[12].mxu0 %v3146_v16 }
 0x186   :  { %v516_v22 = vpack.c.bf16 %v457_v24, %v453_v21  ;;  %v459_v25 = vpop.f32.mrb[47].mxu1  ;;  %2458 = vmatpush3.bf16.msra.mxu0 %v3105_v34  ;;  %2461 = vmatprep.mubr.bf16.mxu0 %v3149_v20  ;;  %v2875_v21 = vld [vmem:[#allocation7 + $0x1e0] ss:$16 sps:$4 sm:$0xff]  }
 0x187   :  { %v3155_v26 = vpack.c.bf16 %v459_v25, %v455_v23  ;;  %2459 = vmatprep.subr.bf16.mxu0 %v3107_v42  ;;  %v2880_v23 = vld [vmem:[#allocation7 + $0x10c] ss:$16 sps:$4 sm:$0xff]   ;;  %v3246_v24 = vld [vmem:[%s3371_s3] ss:$0 sm:$0xff] }
 0x18a   :  { %2460 = vmatpush3.bf16.msra.mxu0 %v3107_v42 }
 0x18b   :  { %v463_v29 = vpop.f32.mrb[48].mxu1  ;;  %2477 = vmatprep.subr.bf16.mxu0 %v3115_v55 }
 0x18c   :  { %v465_v30 = vpop.f32.mrb[49].mxu1 }
 0x18d   :  { %v467_v31 = vpop.f32.mrb[50].mxu1  ;;  %2462 = vmatmul.mubr.bf16.vlgmr.msra.gmra.mrb[0].mxu0 %v3158_v27 }
 0x18e   :  { %v520_v32 = vpack.c.bf16 %v467_v31, %v463_v29  ;;  %v469_v33 = vpop.f32.mrb[51].mxu1  ;;  %2478 = vmatpush3.bf16.msra.mxu0 %v3115_v55  ;;  %2465 = vmatprep.mubr.bf16.mxu0 %v3161_v28 }
 0x18f   :  { %v3167_v34 = vpack.c.bf16 %v469_v33, %v465_v30  ;;  %2479 = vmatprep.subr.bf16.mxu0 %v508_v6 }
 0x192   :  { %2480 = vmatpush3.bf16.msra.mxu0 %v508_v6  ;;  %v3199_v6 = vld [vmem:[#allocation2 + $0x88] ss:$16 sps:$4 sm:$0xff]  }
 0x193   :  { %v473_v37 = vpop.f32.mrb[52].mxu1  ;;  %2481 = vmatprep.subr.bf16.mxu0 %v512_v17 }
 0x194   :  { %v475_v38 = vpop.f32.mrb[53].mxu1 }
 0x195   :  { %v477_v39 = vpop.f32.mrb[54].mxu1  ;;  %2466 = vmatmul.mubr.bf16.gmra.mrb[4].mxu0 %v3169_v35 }
 0x196   :  { %v524_v40 = vpack.c.bf16 %v477_v39, %v473_v37  ;;  %v479_v41 = vpop.f32.mrb[55].mxu1  ;;  %2482 = vmatpush3.bf16.msra.mxu0 %v512_v17  ;;  %2469 = vmatprep.mubr.bf16.mxu0 %v3171_v36  ;;  %v3235_v17 = vld [vmem:[#allocation2 + $0xcc] ss:$16 sps:$4 sm:$0xff]  }
 0x197   :  { %v525_v42 = vpack.c.bf16 %v479_v41, %v475_v38  ;;  %2483 = vmatprep.subr.bf16.mxu0 %v516_v22 }
 0x19a   :  { %2484 = vmatpush3.bf16.msra.mxu0 %v516_v22 }
 0x19b   :  { %v483_v45 = vpop.f32.mrb[56].mxu1  ;;  %2485 = vmatprep.subr.bf16.mxu0 %v520_v32 }
 0x19c   :  { %v485_v46 = vpop.f32.mrb[57].mxu1 }
 0x19d   :  { %v487_v48 = vpop.f32.mrb[58].mxu1  ;;  %2470 = vmatmul.mubr.bf16.gmra.mrb[8].mxu0 %v3175_v43 }
 0x19e   :  { %v528_v50 = vpack.c.bf16 %v487_v48, %v483_v45  ;;  %v489_v51 = vpop.f32.mrb[59].mxu1  ;;  %2486 = vmatpush3.bf16.msra.mxu0 %v520_v32  ;;  %2473 = vmatprep.mubr.bf16.mxu0 %v3177_v44  ;;  %v2883_v45 = vld [vmem:[#allocation7 + $0x12c] ss:$16 sps:$4 sm:$0xff]  }
 0x19f   :  { %v529_v52 = vpack.c.bf16 %v489_v51, %v485_v46  ;;  %2487 = vmatprep.subr.bf16.mxu0 %v524_v40 }
 0x1a2   :  { %2488 = vmatpush3.bf16.msra.mxu0 %v524_v40  ;;  %v2878_v40 = vld [vmem:[#allocation7 + $0x108] ss:$16 sps:$4 sm:$0xff]  }
 0x1a3   :  { %v493_v55 = vpop.f32.mrb[60].mxu1  ;;  %2489 = vmatprep.subr.bf16.mxu0 %v528_v50 }
 0x1a4   :  { %v495_v56 = vpop.f32.mrb[61].mxu1 }
 0x1a5   :  { %v497_v59 = vpop.f32.mrb[62].mxu1  ;;  %2474 = vmatmul.mubr.bf16.gmra.mrb[12].mxu0 %v3181_v53 }
 0x1a6   :  { %v532_v62 = vpack.c.bf16 %v497_v59, %v493_v55  ;;  %v499_v1 = vpop.f32.mrb[63].mxu1  ;;  %2490 = vmatpush3.bf16.msra.mxu0 %v528_v50  ;;  %2493 = vmatprep.mubr.bf16.mxu0 %v3183_v54 }
 0x1a7   :  { %v533_v61 = vpack.c.bf16 %v499_v1, %v495_v56  ;;  %v2881_v56 = vld [vmem:[#allocation7 + $0x128] ss:$16 sps:$4 sm:$0xff]  }
 0x1a8   :  { %2491 = vmatprep.subr.bf16.mxu0 %v532_v62 }
 0x1aa   :  { %2492 = vmatpush3.bf16.msra.mxu0 %v532_v62  ;;  %v2886_v62 = vld [vmem:[#allocation7 + $0x14c] ss:$16 sps:$4 sm:$0xff]  }
 0x1ab   :  { %2509 = vmatprep.subr.bf16.mxu0 %v3119_v58 }
 0x1ad   :  { %2494 = vmatmul.mubr.bf16.vlgmr.msra.gmra.mrb[0].mxu0 %v3187_v2 }
 0x1ae   :  { %2510 = vmatpush3.bf16.msra.mxu0 %v3119_v58  ;;  %2497 = vmatprep.mubr.bf16.mxu0 %v3189_v3  ;;  %v3206_v58 = vld [vmem:[#allocation2 + $0xa8] ss:$16 sps:$4 sm:$0xff]  }
 0x1af   :  { %2511 = vmatprep.subr.bf16.mxu0 %v3131_v4 }
 0x1b2   :  { %2512 = vmatpush3.bf16.msra.mxu0 %v3131_v4  ;;  %v3215_v4 = vld [vmem:[#allocation2 + $0xe8] ss:$16 sps:$4 sm:$0xff]  }
 0x1b3   :  { %2513 = vmatprep.subr.bf16.mxu0 %v3143_v19 }
 0x1b5   :  { %2498 = vmatmul.mubr.bf16.gmra.mrb[4].mxu0 %v3196_v5 }
 0x1b6   :  { %2514 = vmatpush3.bf16.msra.mxu0 %v3143_v19  ;;  %2501 = vmatprep.mubr.bf16.mxu0 %v3199_v6  ;;  %v2877_v19 = vld [vmem:[#allocation7 + $0x1e4] ss:$16 sps:$4 sm:$0xff]  }
 0x1b7   :  { %2515 = vmatprep.subr.bf16.mxu0 %v3155_v26  ;;  %1464 = vmatprep.subr.bf16.mxu1 %v2877_v19 }
 0x1b8   :  { %1465 = vmatpush1.bf16.msra.mxu1 %v2875_v21 }
 0x1b9   :  { %1563 = vmatprep.subr.bf16.mxu1 %v2880_v23 }
 0x1ba   :  { %2516 = vmatpush3.bf16.msra.mxu0 %v3155_v26 }
 0x1bb   :  { %2517 = vmatprep.subr.bf16.mxu0 %v3167_v34 }
 0x1bd   :  { %2502 = vmatmul.mubr.bf16.gmra.mrb[8].mxu0 %v3206_v58 }
 0x1be   :  { %2518 = vmatpush3.bf16.msra.mxu0 %v3167_v34  ;;  %2505 = vmatprep.mubr.bf16.mxu0 %v3209_v7 }
 0x1bf   :  { %2519 = vmatprep.subr.bf16.mxu0 %v525_v42 }
 0x1c2   :  { %2520 = vmatpush3.bf16.msra.mxu0 %v525_v42 }
 0x1c3   :  { %2521 = vmatprep.subr.bf16.mxu0 %v529_v52 }
 0x1c5   :  { %2506 = vmatmul.mubr.bf16.gmra.mrb[12].mxu0 %v3215_v4 }
 0x1c6   :  { %2522 = vmatpush3.bf16.msra.mxu0 %v529_v52  ;;  %2525 = vmatprep.mubr.bf16.mxu0 %v3217_v8 }
 0x1c7   :  { %2523 = vmatprep.subr.bf16.mxu0 %v533_v61 }
 0x1ca   :  { %2524 = vmatpush3.bf16.msra.mxu0 %v533_v61 }
 0x1cd   :  { %2526 = vmatmul.mubr.bf16.vlgmr.msra.gmra.mrb[0].mxu0 %v3221_v11 }
 0x1ce   :  { %2529 = vmatprep.mubr.bf16.mxu0 %v3223_v13 }
 0x1d5   :  { %2530 = vmatmul.mubr.bf16.gmra.mrb[4].mxu0 %v3227_v10 }
 0x1d6   :  { %2533 = vmatprep.mubr.bf16.mxu0 %v3229_v14 }
 0x1dd   :  { %2534 = vmatmul.mubr.bf16.gmra.mrb[8].mxu0 %v3233_v15 }
 0x1de   :  { %2537 = vmatprep.mubr.bf16.mxu0 %v3235_v17 }
 0x1e5   :  { %2538 = vmatmul.mubr.bf16.gmra.mrb[12].mxu0 %v3239_v18 }
 0x1e6   :  { %2557 = vmatprep.mubr.bf16.mxu0 %v3090_v57 }
 0x2a0   :  { %v2527_v22 = vpop.f32.mrb[0].mxu0 }
 0x2a1   :  { %v1219_v25 = vadd.f32 %v2527_v22, %v3246_v24  ;;  %v1131_v26 = vpop.f32.mrb[1].mxu0  ;;  %v2884_v22 = vld [vmem:[#allocation7 + $0x148] ss:$16 sps:$4 sm:$0xff]  }
 0x2a2   :  { %v1217_v29 = vadd.f32 %v3246_v24, %v1131_v26  ;;  %v2528_v30 = vpop.f32.mrb[2].mxu0 }
 0x2a3   :  { %v1220_v57 = vadd.f32 %v2528_v30, %v3246_v24  ;;  %v1134_v31 = vpop.f32.mrb[3].mxu0  ;;  %v1235_v33 = vmax.f32 %v1219_v25, 0.0 }
 0x2a4   :  { %v1218_v32 = vadd.f32 %v3246_v24, %v1134_v31  ;;  %v1233_v37 = vmax.f32 %v1217_v29, 0.0  ;;  %v2889_v29 = vld [vmem:[#allocation7 + $0x16c] ss:$16 sps:$4 sm:$0xff]  }
 0x2a5   :  { %v1236_v34 = vmax.f32 %v1220_v57, 0.0 }
 0x2a6   :  { %v1234_v38 = vmax.f32 %v1218_v32, 0.0 }
 0x2a7   :  { %v3252_v39 = vpack.c.bf16 %v1236_v34, %v1235_v33 }
 0x2a8   :  { %v3254_v41 = vpack.c.bf16 %v1234_v38, %v1233_v37  ;;  %v2531_v42 = vpop.f32.mrb[4].mxu0  ;;  %v2887_v37 = vld [vmem:[#allocation7 + $0x168] ss:$16 sps:$4 sm:$0xff]  }
 0x2a9   :  { %v1223_v46 = vadd.f32 %v2531_v42, %v3246_v24  ;;  %v1147_v48 = vpop.f32.mrb[5].mxu0 }
 0x2aa   :  { %v1221_v50 = vadd.f32 %v3246_v24, %v1147_v48  ;;  %v2532_v51 = vpop.f32.mrb[6].mxu0  ;;  %1483 = vmatmul.mubr.bf16.vlgmr.msra.gmra.mrb[64].mxu1 %v3254_v41 }
 0x2ab   :  { %v1224_v52 = vadd.f32 %v2532_v51, %v3246_v24  ;;  %v1150_v55 = vpop.f32.mrb[7].mxu0  ;;  %1564 = vmatpush1.bf16.msra.mxu1 %v2878_v40  ;;  %1492 = vmatprep.mubr.bf16.mxu1 %v3003_v0  ;;  %v1239_v1 = vmax.f32 %v1223_v46, 0.0  ;;  %v2892_v40 = vld [vmem:[#allocation7 + $0x18c] ss:$16 sps:$4 sm:$0xff]   ;;  %v2890_v51 = vld [vmem:[#allocation7 + $0x188] ss:$16 sps:$4 sm:$0xff]  }
 0x2ac   :  { %v1222_v59 = vadd.f32 %v3246_v24, %v1150_v55  ;;  %1565 = vmatprep.subr.bf16.mxu1 %v2883_v45  ;;  %v1237_v19 = vmax.f32 %v1221_v50, 0.0 }
 0x2ad   :  { %v1240_v61 = vmax.f32 %v1224_v52, 0.0 }
 0x2ae   :  { %v1238_v21 = vmax.f32 %v1222_v59, 0.0 }
 0x2af   :  { %v3262_v23 = vpack.c.bf16 %v1240_v61, %v1239_v1  ;;  %1566 = vmatpush1.bf16.msra.mxu1 %v2881_v56  ;;  %v2895_v56 = vld [vmem:[#allocation7 + $0x1ac] ss:$16 sps:$4 sm:$0xff]  }
 0x2b0   :  { %v3264_v25 = vpack.c.bf16 %v1238_v21, %v1237_v19  ;;  %v2535_v26 = vpop.f32.mrb[8].mxu0  ;;  %1567 = vmatprep.subr.bf16.mxu1 %v2886_v62 }
 0x2b1   :  { %v1227_v30 = vadd.f32 %v2535_v26, %v3246_v24  ;;  %v1163_v57 = vpop.f32.mrb[9].mxu0 }
 0x2b2   :  { %v1225_v31 = vadd.f32 %v3246_v24, %v1163_v57  ;;  %v2536_v32 = vpop.f32.mrb[10].mxu0  ;;  %1493 = vmatmul.mubr.bf16.gmra.mrb[68].mxu1 %v3252_v39 }
 0x2b3   :  { %v1228_v33 = vadd.f32 %v2536_v32, %v3246_v24  ;;  %v1166_v34 = vpop.f32.mrb[11].mxu0  ;;  %1502 = vmatprep.mubr.bf16.mxu1 %v3003_v0  ;;  %1568 = vmatpush1.bf16.msra.mxu1 %v2884_v22  ;;  %v1243_v42 = vmax.f32 %v1227_v30, 0.0  ;;  %v2893_v22 = vld [vmem:[#allocation7 + $0x1a8] ss:$16 sps:$4 sm:$0xff]  }
 0x2b4   :  { %v1226_v38 = vadd.f32 %v3246_v24, %v1166_v34  ;;  %1569 = vmatprep.subr.bf16.mxu1 %v2889_v29  ;;  %v1241_v46 = vmax.f32 %v1225_v31, 0.0  ;;  %v2898_v29 = vld [vmem:[#allocation7 + $0x1cc] ss:$16 sps:$4 sm:$0xff]   ;;  %v2896_v34 = vld [vmem:[#allocation7 + $0x1c8] ss:$16 sps:$4 sm:$0xff]  }
 0x2b5   :  { %v1244_v45 = vmax.f32 %v1228_v33, 0.0 }
 0x2b6   :  { %v1242_v48 = vmax.f32 %v1226_v38, 0.0  ;;  %v2901_v38 = vld [vmem:[#allocation7 + $0x1ec] ss:$16 sps:$4 sm:$0xff]  }
 0x2b7   :  { %v1254_v50 = vpack.c.bf16 %v1244_v45, %v1243_v42  ;;  %1570 = vmatpush1.bf16.msra.mxu1 %v2887_v37 }
 0x2b8   :  { %v1253_v52 = vpack.c.bf16 %v1242_v48, %v1241_v46  ;;  %v2539_v55 = vpop.f32.mrb[12].mxu0  ;;  %1571 = vmatprep.subr.bf16.mxu1 %v2892_v40  ;;  %v2899_v40 = vld [vmem:[#allocation7 + $0x1e8] ss:$16 sps:$4 sm:$0xff]  }
 0x2b9   :  { %v1231_v59 = vadd.f32 %v2539_v55, %v3246_v24  ;;  %v1179_v62 = vpop.f32.mrb[13].mxu0 }
 0x2ba   :  { %v1229_v1 = vadd.f32 %v3246_v24, %v1179_v62  ;;  %v2540_v61 = vpop.f32.mrb[14].mxu0  ;;  %1503 = vmatmul.mubr.bf16.gmra.mrb[72].mxu1 %v3264_v25 }
 0x2bb   :  { %v1232_v19 = vadd.f32 %v2540_v61, %v3246_v24  ;;  %v1182_v21 = vpop.f32.mrb[15].mxu0  ;;  %1512 = vmatprep.mubr.bf16.mxu1 %v3003_v0  ;;  %1572 = vmatpush1.bf16.msra.mxu1 %v2890_v51  ;;  %v1247_v30 = vmax.f32 %v1231_v59, 0.0 }
 0x2bc   :  { %v1230_v26 = vadd.f32 %v3246_v24, %v1182_v21  ;;  %1573 = vmatprep.subr.bf16.mxu1 %v2895_v56  ;;  %v1245_v31 = vmax.f32 %v1229_v1, 0.0 }
 0x2bd   :  { %v1248_v57 = vmax.f32 %v1232_v19, 0.0 }
 0x2be   :  { %v1246_v32 = vmax.f32 %v1230_v26, 0.0 }
 0x2bf   :  { %v1256_v33 = vpack.c.bf16 %v1248_v57, %v1247_v30  ;;  %1574 = vmatpush1.bf16.msra.mxu1 %v2893_v22 }
 0x2c0   :  { %v1255_v37 = vpack.c.bf16 %v1246_v32, %v1245_v31  ;;  %1575 = vmatprep.subr.bf16.mxu1 %v2898_v29 }
 0x2c2   :  { %1513 = vmatmul.mubr.bf16.gmra.mrb[76].mxu1 %v3262_v23 }
 0x2c3   :  { %1522 = vmatprep.mubr.bf16.mxu1 %v3003_v0  ;;  %1576 = vmatpush1.bf16.msra.mxu1 %v2896_v34 }
 0x2c4   :  { %1577 = vmatprep.subr.bf16.mxu1 %v2901_v38 }
 0x2c7   :  { %1578 = vmatpush1.bf16.msra.mxu1 %v2899_v40 }
 0x2ca   :  { %1523 = vmatmul.mubr.bf16.gmra.mrb[80].mxu1 %v1253_v52 }
 0x2cb   :  { %1532 = vmatprep.mubr.bf16.mxu1 %v3003_v0 }
 0x2d2   :  { %1533 = vmatmul.mubr.bf16.gmra.mrb[84].mxu1 %v1254_v50 }
 0x2d3   :  { %1542 = vmatprep.mubr.bf16.mxu1 %v3003_v0 }
 0x2da   :  { %1543 = vmatmul.mubr.bf16.gmra.mrb[88].mxu1 %v1255_v37 }
 0x2db   :  { %1552 = vmatprep.mubr.bf16.mxu1 %v3003_v0 }
 0x2e2   :  { %1553 = vmatmul.mubr.bf16.gmra.mrb[92].mxu1 %v1256_v33 }
 0x2e3   :  { %1595 = vmatprep.mubr.bf16.mxu1 %v3003_v0 }
 0x2ea   :  { %1596 = vmatmul.mubr.bf16.vlgmr.msra.gmra.mrb[96].mxu1 %v3254_v41 }
 0x2eb   :  { %1605 = vmatprep.mubr.bf16.mxu1 %v3003_v0 }
 0x2f2   :  { %1606 = vmatmul.mubr.bf16.gmra.mrb[100].mxu1 %v3252_v39 }
 0x2f3   :  { %1615 = vmatprep.mubr.bf16.mxu1 %v3003_v0 }
 0x2fa   :  { %1616 = vmatmul.mubr.bf16.gmra.mrb[104].mxu1 %v3264_v25 }
 0x2fb   :  { %1625 = vmatprep.mubr.bf16.mxu1 %v3003_v0 }
 0x302   :  { %1626 = vmatmul.mubr.bf16.gmra.mrb[108].mxu1 %v3262_v23 }
 0x303   :  { %1635 = vmatprep.mubr.bf16.mxu1 %v3003_v0 }
 0x30a   :  { %1636 = vmatmul.mubr.bf16.gmra.mrb[112].mxu1 %v1253_v52 }
 0x30b   :  { %1645 = vmatprep.mubr.bf16.mxu1 %v3003_v0 }
 0x312   :  { %1646 = vmatmul.mubr.bf16.gmra.mrb[116].mxu1 %v1254_v50 }
 0x313   :  { %1655 = vmatprep.mubr.bf16.mxu1 %v3003_v0 }
 0x31a   :  { %1656 = vmatmul.mubr.bf16.gmra.mrb[120].mxu1 %v1255_v37 }
 0x31b   :  { %1665 = vmatprep.mubr.bf16.mxu1 %v3003_v0 }
 0x322   :  { %1666 = vmatmul.mubr.bf16.gmra.mrb[124].mxu1 %v1256_v33 }
 0x37d   :  { %v1484_v24 = vpop.f32.mrb[64].mxu1 }
 0x37e   :  { %v1486_v39 = vpop.f32.mrb[65].mxu1 }
 0x37f   :  { %v1488_v41 = vpop.f32.mrb[66].mxu1 }
 0x380   :  { %v3295_v25 = vpack.c.bf16 %v1488_v41, %v1484_v24  ;;  %v1490_v42 = vpop.f32.mrb[67].mxu1 }
 0x381   :  { %v1677_v45 = vpack.c.bf16 %v1490_v42, %v1486_v39 }
 0x383   :  { %2541 = vmatprep.subr.bf16.mxu0 %v1677_v45 }
 0x384   :  { %2542 = vmatpush3.bf16.msra.mxu0 %v1677_v45 }
 0x385   :  { %v1494_v23 = vpop.f32.mrb[68].mxu1 }
 0x386   :  { %v1496_v46 = vpop.f32.mrb[69].mxu1 }
 0x387   :  { %v1498_v48 = vpop.f32.mrb[70].mxu1 }
 0x388   :  { %v3297_v51 = vpack.c.bf16 %v1498_v48, %v1494_v23  ;;  %v1500_v50 = vpop.f32.mrb[71].mxu1 }
 0x389   :  { %v1681_v52 = vpack.c.bf16 %v1500_v50, %v1496_v46 }
 0x38b   :  { %2543 = vmatprep.subr.bf16.mxu0 %v1681_v52 }
 0x38c   :  { %2544 = vmatpush3.bf16.msra.mxu0 %v1681_v52 }
 0x38d   :  { %v1504_v0 = vpop.f32.mrb[72].mxu1 }
 0x38e   :  { %v1506_v55 = vpop.f32.mrb[73].mxu1 }
 0x38f   :  { %v1508_v56 = vpop.f32.mrb[74].mxu1 }
 0x390   :  { %v3299_v59 = vpack.c.bf16 %v1508_v56, %v1504_v0  ;;  %v1510_v62 = vpop.f32.mrb[75].mxu1 }
 0x391   :  { %v1685_v1 = vpack.c.bf16 %v1510_v62, %v1506_v55 }
 0x393   :  { %2545 = vmatprep.subr.bf16.mxu0 %v1685_v1 }
 0x394   :  { %2546 = vmatpush3.bf16.msra.mxu0 %v1685_v1 }
 0x395   :  { %v1514_v61 = vpop.f32.mrb[76].mxu1 }
 0x396   :  { %v1516_v19 = vpop.f32.mrb[77].mxu1 }
 0x397   :  { %v1518_v21 = vpop.f32.mrb[78].mxu1 }
 0x398   :  { %v1688_v22 = vpack.c.bf16 %v1518_v21, %v1514_v61  ;;  %v1520_v26 = vpop.f32.mrb[79].mxu1 }
 0x399   :  { %v1689_v29 = vpack.c.bf16 %v1520_v26, %v1516_v19 }
 0x39b   :  { %2547 = vmatprep.subr.bf16.mxu0 %v1689_v29 }
 0x39c   :  { %2548 = vmatpush3.bf16.msra.mxu0 %v1689_v29 }
 0x39d   :  { %v1524_v30 = vpop.f32.mrb[80].mxu1 }
 0x39e   :  { %v1526_v57 = vpop.f32.mrb[81].mxu1 }
 0x39f   :  { %v1528_v31 = vpop.f32.mrb[82].mxu1 }
 0x3a0   :  { %v1692_v32 = vpack.c.bf16 %v1528_v31, %v1524_v30  ;;  %v1530_v33 = vpop.f32.mrb[83].mxu1 }
 0x3a1   :  { %v1693_v34 = vpack.c.bf16 %v1530_v33, %v1526_v57 }
 0x3a3   :  { %2549 = vmatprep.subr.bf16.mxu0 %v1693_v34 }
 0x3a4   :  { %2550 = vmatpush3.bf16.msra.mxu0 %v1693_v34 }
 0x3a5   :  { %v1534_v37 = vpop.f32.mrb[84].mxu1 }
 0x3a6   :  { %v1536_v38 = vpop.f32.mrb[85].mxu1 }
 0x3a7   :  { %v1538_v40 = vpop.f32.mrb[86].mxu1 }
 0x3a8   :  { %v1696_v24 = vpack.c.bf16 %v1538_v40, %v1534_v37  ;;  %v1540_v39 = vpop.f32.mrb[87].mxu1 }
 0x3a9   :  { %v1697_v41 = vpack.c.bf16 %v1540_v39, %v1536_v38 }
 0x3ab   :  { %2551 = vmatprep.subr.bf16.mxu0 %v1697_v41 }
 0x3ac   :  { %2552 = vmatpush3.bf16.msra.mxu0 %v1697_v41 }
 0x3ad   :  { %v1544_v42 = vpop.f32.mrb[88].mxu1 }
 0x3ae   :  { %v1546_v45 = vpop.f32.mrb[89].mxu1 }
 0x3af   :  { %v1548_v23 = vpop.f32.mrb[90].mxu1 }
 0x3b0   :  { %v1700_v46 = vpack.c.bf16 %v1548_v23, %v1544_v42  ;;  %v1550_v48 = vpop.f32.mrb[91].mxu1 }
 0x3b1   :  { %v1701_v50 = vpack.c.bf16 %v1550_v48, %v1546_v45 }
 0x3b3   :  { %2553 = vmatprep.subr.bf16.mxu0 %v1701_v50 }
 0x3b4   :  { %2554 = vmatpush3.bf16.msra.mxu0 %v1701_v50 }
 0x3b5   :  { %v1554_v52 = vpop.f32.mrb[92].mxu1 }
 0x3b6   :  { %v1556_v0 = vpop.f32.mrb[93].mxu1 }
 0x3b7   :  { %v1558_v55 = vpop.f32.mrb[94].mxu1 }
 0x3b8   :  { %v1704_v56 = vpack.c.bf16 %v1558_v55, %v1554_v52  ;;  %v1560_v62 = vpop.f32.mrb[95].mxu1 }
 0x3b9   :  { %v1705_v1 = vpack.c.bf16 %v1560_v62, %v1556_v0 }
 0x3bb   :  { %2555 = vmatprep.subr.bf16.mxu0 %v1705_v1 }
 0x3bc   :  { %2556 = vmatpush3.bf16.msra.mxu0 %v1705_v1 }
 0x3bd   :  { %v1597_v61 = vpop.f32.mrb[96].mxu1  ;;  %2573 = vmatprep.subr.bf16.mxu0 %v3295_v25 }
 0x3be   :  { %v1599_v19 = vpop.f32.mrb[97].mxu1 }
 0x3bf   :  { %v1601_v21 = vpop.f32.mrb[98].mxu1  ;;  %2558 = vmatmul.mubr.bf16.vlgmr.msra.gmra.mrb[16].mxu0 %v3109_v47 }
 0x3c0   :  { %v1678_v26 = vpack.c.bf16 %v1601_v21, %v1597_v61  ;;  %v1603_v29 = vpop.f32.mrb[99].mxu1  ;;  %2574 = vmatpush3.bf16.msra.mxu0 %v3295_v25  ;;  %2561 = vmatprep.mubr.bf16.mxu0 %v3111_v49 }
 0x3c1   :  { %v3305_v30 = vpack.c.bf16 %v1603_v29, %v1599_v19  ;;  %2575 = vmatprep.subr.bf16.mxu0 %v3297_v51 }
 0x3c4   :  { %2576 = vmatpush3.bf16.msra.mxu0 %v3297_v51 }
 0x3c5   :  { %v1607_v57 = vpop.f32.mrb[100].mxu1  ;;  %2577 = vmatprep.subr.bf16.mxu0 %v3299_v59 }
 0x3c6   :  { %v1609_v31 = vpop.f32.mrb[101].mxu1 }
 0x3c7   :  { %v1611_v33 = vpop.f32.mrb[102].mxu1  ;;  %2562 = vmatmul.mubr.bf16.gmra.mrb[20].mxu0 %v3122_v60 }
 0x3c8   :  { %v1682_v47 = vpack.c.bf16 %v1611_v33, %v1607_v57  ;;  %v1613_v34 = vpop.f32.mrb[103].mxu1  ;;  %2578 = vmatpush3.bf16.msra.mxu0 %v3299_v59  ;;  %2565 = vmatprep.mubr.bf16.mxu0 %v3125_v63 }
 0x3c9   :  { %v3313_v49 = vpack.c.bf16 %v1613_v34, %v1609_v31  ;;  %2579 = vmatprep.subr.bf16.mxu0 %v1688_v22 }
 0x3cc   :  { %2580 = vmatpush3.bf16.msra.mxu0 %v1688_v22 }
 0x3cd   :  { %v1617_v25 = vpop.f32.mrb[104].mxu1  ;;  %2581 = vmatprep.subr.bf16.mxu0 %v1692_v32 }
 0x3ce   :  { %v1619_v51 = vpop.f32.mrb[105].mxu1 }
 0x3cf   :  { %v1621_v37 = vpop.f32.mrb[106].mxu1  ;;  %2566 = vmatmul.mubr.bf16.gmra.mrb[24].mxu0 %v3134_v9 }
 0x3d0   :  { %v1686_v38 = vpack.c.bf16 %v1621_v37, %v1617_v25  ;;  %v1623_v40 = vpop.f32.mrb[107].mxu1  ;;  %2582 = vmatpush3.bf16.msra.mxu0 %v1692_v32  ;;  %2569 = vmatprep.mubr.bf16.mxu0 %v3137_v12 }
 0x3d1   :  { %v3317_v60 = vpack.c.bf16 %v1623_v40, %v1619_v51  ;;  %2583 = vmatprep.subr.bf16.mxu0 %v1696_v24 }
 0x3d4   :  { %2584 = vmatpush3.bf16.msra.mxu0 %v1696_v24 }
 0x3d5   :  { %v1627_v63 = vpop.f32.mrb[108].mxu1  ;;  %2585 = vmatprep.subr.bf16.mxu0 %v1700_v46 }
 0x3d6   :  { %v1629_v59 = vpop.f32.mrb[109].mxu1 }
 0x3d7   :  { %v1631_v39 = vpop.f32.mrb[110].mxu1  ;;  %2570 = vmatmul.mubr.bf16.gmra.mrb[28].mxu0 %v3146_v16 }
 0x3d8   :  { %v1690_v22 = vpack.c.bf16 %v1631_v39, %v1627_v63  ;;  %v1633_v41 = vpop.f32.mrb[111].mxu1  ;;  %2586 = vmatpush3.bf16.msra.mxu0 %v1700_v46  ;;  %2589 = vmatprep.mubr.bf16.mxu0 %v3149_v20 }
 0x3d9   :  { %v1691_v9 = vpack.c.bf16 %v1633_v41, %v1629_v59  ;;  %2587 = vmatprep.subr.bf16.mxu0 %v1704_v56 }
 0x3dc   :  { %2588 = vmatpush3.bf16.msra.mxu0 %v1704_v56 }
 0x3dd   :  { %v1637_v32 = vpop.f32.mrb[112].mxu1  ;;  %2605 = vmatprep.subr.bf16.mxu0 %v1678_v26 }
 0x3de   :  { %v1639_v12 = vpop.f32.mrb[113].mxu1 }
 0x3df   :  { %v1641_v42 = vpop.f32.mrb[114].mxu1  ;;  %2590 = vmatmul.mubr.bf16.vlgmr.msra.gmra.mrb[16].mxu0 %v3158_v27 }
 0x3e0   :  { %v1694_v24 = vpack.c.bf16 %v1641_v42, %v1637_v32  ;;  %v1643_v45 = vpop.f32.mrb[115].mxu1  ;;  %2606 = vmatpush3.bf16.msra.mxu0 %v1678_v26  ;;  %2593 = vmatprep.mubr.bf16.mxu0 %v3161_v28 }
 0x3e1   :  { %v1695_v16 = vpack.c.bf16 %v1643_v45, %v1639_v12  ;;  %2607 = vmatprep.subr.bf16.mxu0 %v1682_v47 }
 0x3e4   :  { %2608 = vmatpush3.bf16.msra.mxu0 %v1682_v47 }
 0x3e5   :  { %v1647_v23 = vpop.f32.mrb[116].mxu1  ;;  %2609 = vmatprep.subr.bf16.mxu0 %v1686_v38 }
 0x3e6   :  { %v1649_v20 = vpop.f32.mrb[117].mxu1 }
 0x3e7   :  { %v1651_v46 = vpop.f32.mrb[118].mxu1  ;;  %2594 = vmatmul.mubr.bf16.gmra.mrb[20].mxu0 %v3169_v35 }
 0x3e8   :  { %v1698_v48 = vpack.c.bf16 %v1651_v46, %v1647_v23  ;;  %v1653_v50 = vpop.f32.mrb[119].mxu1  ;;  %2610 = vmatpush3.bf16.msra.mxu0 %v1686_v38  ;;  %2597 = vmatprep.mubr.bf16.mxu0 %v3171_v36 }
 0x3e9   :  { %v1699_v27 = vpack.c.bf16 %v1653_v50, %v1649_v20  ;;  %2611 = vmatprep.subr.bf16.mxu0 %v1690_v22 }
 0x3ec   :  { %2612 = vmatpush3.bf16.msra.mxu0 %v1690_v22 }
 0x3ed   :  { %v1657_v52 = vpop.f32.mrb[120].mxu1  ;;  %2613 = vmatprep.subr.bf16.mxu0 %v1694_v24 }
 0x3ee   :  { %v1659_v28 = vpop.f32.mrb[121].mxu1 }
 0x3ef   :  { %v1661_v0 = vpop.f32.mrb[122].mxu1  ;;  %2598 = vmatmul.mubr.bf16.gmra.mrb[24].mxu0 %v3175_v43 }
 0x3f0   :  { %v1702_v55 = vpack.c.bf16 %v1661_v0, %v1657_v52  ;;  %v1663_v56 = vpop.f32.mrb[123].mxu1  ;;  %2614 = vmatpush3.bf16.msra.mxu0 %v1694_v24  ;;  %2601 = vmatprep.mubr.bf16.mxu0 %v3177_v44  ;;  %v2284_v44 = vld [vmem:[%s3371_s3 + $0x1] ss:$0 sm:$0xff]  ;;  %s3004_s3 = smov [#allocation8]  }
 0x3f1   :  { %v1703_v35 = vpack.c.bf16 %v1663_v56, %v1659_v28  ;;  %2615 = vmatprep.subr.bf16.mxu0 %v1698_v48  ;;  %s2173_s6 = sshll.u32 %s3004_s3, 4  ;;  %s2174_s6 = int_to_ptr.vmem [resolvable:$true] %s2173_s6 }
 0x3f2   :  { %s2968_s7 = scalar_lea.vmem %s2174_s6, 2048  ;;  %p2973_p11 = scmp.lt.s32.totalorder %s2174_s6, %s2174_s6 }
 0x3f3   :  { %p2969_p10 = scmp.ne.s32.totalorder %s2174_s6, %s2968_s7  ;;  %p2974_p12 = scmp.lt.s32.totalorder %s2968_s7, %s2968_s7 }
 0x3f4   :  { %2616 = vmatpush3.bf16.msra.mxu0 %v1698_v48 }
 0x3f5   :  { %v1667_v62 = vpop.f32.mrb[124].mxu1  ;;  %2617 = vmatprep.subr.bf16.mxu0 %v1702_v55  ;;  %p2975_p13 = por %p2974_p12, %p2973_p11 }
 0x3f6   :  { %v1669_v36 = vpop.f32.mrb[125].mxu1 }
 0x3f7   :  { %v1671_v1 = vpop.f32.mrb[126].mxu1  ;;  %2602 = vmatmul.mubr.bf16.gmra.mrb[28].mxu0 %v3181_v53  ;;  %p2976_p0 = pnand %p2975_p13, %p2969_p10 }
 0x3f8   :  { %v1706_v61 = vpack.c.bf16 %v1671_v1, %v1667_v62  ;;  %v1673_v19 = vpop.f32.mrb[127].mxu1  ;;  %2618 = vmatpush3.bf16.msra.mxu0 %v1702_v55  ;;  %2621 = vmatprep.mubr.bf16.mxu0 %v3183_v54 }
 0x3f9   :  { %v1707_v43 = vpack.c.bf16 %v1673_v19, %v1669_v36 }
 0x3fa   :  { %2619 = vmatprep.subr.bf16.mxu0 %v1706_v61 }
 0x3fc   :  { %2620 = vmatpush3.bf16.msra.mxu0 %v1706_v61 }
 0x3fd   :  { %2637 = vmatprep.subr.bf16.mxu0 %v3305_v30 }
 0x3ff   :  { %2622 = vmatmul.mubr.bf16.vlgmr.msra.gmra.mrb[16].mxu0 %v3187_v2 }
 0x400   :  { %2638 = vmatpush3.bf16.msra.mxu0 %v3305_v30  ;;  %2625 = vmatprep.mubr.bf16.mxu0 %v3189_v3 }
 0x401   :  { %2639 = vmatprep.subr.bf16.mxu0 %v3313_v49 }
 0x404   :  { %2640 = vmatpush3.bf16.msra.mxu0 %v3313_v49 }
 0x405   :  { %2641 = vmatprep.subr.bf16.mxu0 %v3317_v60 }
 0x407   :  { %2626 = vmatmul.mubr.bf16.gmra.mrb[20].mxu0 %v3196_v5 }
 0x408   :  { %2642 = vmatpush3.bf16.msra.mxu0 %v3317_v60  ;;  %2629 = vmatprep.mubr.bf16.mxu0 %v3199_v6 }
 0x409   :  { %2643 = vmatprep.subr.bf16.mxu0 %v1691_v9 }
 0x40c   :  { %2644 = vmatpush3.bf16.msra.mxu0 %v1691_v9 }
 0x40d   :  { %2645 = vmatprep.subr.bf16.mxu0 %v1695_v16 }
 0x40f   :  { %2630 = vmatmul.mubr.bf16.gmra.mrb[24].mxu0 %v3206_v58 }
 0x410   :  { %2646 = vmatpush3.bf16.msra.mxu0 %v1695_v16  ;;  %2633 = vmatprep.mubr.bf16.mxu0 %v3209_v7 }
 0x411   :  { %2647 = vmatprep.subr.bf16.mxu0 %v1699_v27 }
 0x414   :  { %2648 = vmatpush3.bf16.msra.mxu0 %v1699_v27 }
 0x415   :  { %2649 = vmatprep.subr.bf16.mxu0 %v1703_v35 }
 0x417   :  { %2634 = vmatmul.mubr.bf16.gmra.mrb[28].mxu0 %v3215_v4 }
 0x418   :  { %2650 = vmatpush3.bf16.msra.mxu0 %v1703_v35  ;;  %2653 = vmatprep.mubr.bf16.mxu0 %v3217_v8 }
 0x419   :  { %2651 = vmatprep.subr.bf16.mxu0 %v1707_v43 }
 0x41c   :  { %2652 = vmatpush3.bf16.msra.mxu0 %v1707_v43 }
 0x41f   :  { %2654 = vmatmul.mubr.bf16.vlgmr.msra.gmra.mrb[16].mxu0 %v3221_v11 }
 0x420   :  { %2657 = vmatprep.mubr.bf16.mxu0 %v3223_v13 }
 0x427   :  { %2658 = vmatmul.mubr.bf16.gmra.mrb[20].mxu0 %v3227_v10 }
 0x428   :  { %2661 = vmatprep.mubr.bf16.mxu0 %v3229_v14 }
 0x42f   :  { %2662 = vmatmul.mubr.bf16.gmra.mrb[24].mxu0 %v3233_v15 }
 0x430   :  { %2665 = vmatprep.mubr.bf16.mxu0 %v3235_v17 }
 0x437   :  { %2666 = vmatmul.mubr.bf16.gmra.mrb[28].mxu0 %v3239_v18 }
 0x4f2   :  { %v2655_v53 = vpop.f32.mrb[16].mxu0 }
 0x4f3   :  { %v2138_v54 = vadd.f32 %v2655_v53, %v2284_v44  ;;  %v2049_v2 = vpop.f32.mrb[17].mxu0 }
 0x4f4   :  { %v2136_v3 = vadd.f32 %v2284_v44, %v2049_v2  ;;  %v2656_v5 = vpop.f32.mrb[18].mxu0 }
 0x4f5   :  { %2154 = vst [vmem:[#allocation8 + $0x10] sm:$0xff] %v2138_v54  ;;  %v2139_v6 = vadd.f32 %v2656_v5, %v2284_v44  ;;  %v2052_v58 = vpop.f32.mrb[19].mxu0 }
 0x4f6   :  { %2152 = vst [vmem:[#allocation8] sm:$0xff] %v2136_v3  ;;  %v2137_v7 = vadd.f32 %v2284_v44, %v2052_v58 }
 0x4f7   :  { %2155 = vst [vmem:[#allocation8 + $0x18] sm:$0xff] %v2139_v6 }
 0x4f8   :  { %2153 = vst [vmem:[#allocation8 + $0x8] sm:$0xff] %v2137_v7 }
 0x4fa   :  { %v2659_v4 = vpop.f32.mrb[20].mxu0 }
 0x4fb   :  { %v2142_v8 = vadd.f32 %v2659_v4, %v2284_v44  ;;  %v2065_v11 = vpop.f32.mrb[21].mxu0 }
 0x4fc   :  { %v2140_v13 = vadd.f32 %v2284_v44, %v2065_v11  ;;  %v2660_v10 = vpop.f32.mrb[22].mxu0 }
 0x4fd   :  { %2158 = vst [vmem:[#allocation8 + $0x30] sm:$0xff] %v2142_v8  ;;  %v2143_v14 = vadd.f32 %v2660_v10, %v2284_v44  ;;  %v2068_v15 = vpop.f32.mrb[23].mxu0 }
 0x4fe   :  { %2156 = vst [vmem:[#allocation8 + $0x20] sm:$0xff] %v2140_v13  ;;  %v2141_v17 = vadd.f32 %v2284_v44, %v2068_v15 }
 0x4ff   :  { %2159 = vst [vmem:[#allocation8 + $0x38] sm:$0xff] %v2143_v14 }
 0x500   :  { %2157 = vst [vmem:[#allocation8 + $0x28] sm:$0xff] %v2141_v17 }
 0x502   :  { %v2663_v18 = vpop.f32.mrb[24].mxu0 }
 0x503   :  { %v2146_v21 = vadd.f32 %v2663_v18, %v2284_v44  ;;  %v2081_v26 = vpop.f32.mrb[25].mxu0 }
 0x504   :  { %v2144_v29 = vadd.f32 %v2284_v44, %v2081_v26  ;;  %v2664_v30 = vpop.f32.mrb[26].mxu0 }
 0x505   :  { %2162 = vst [vmem:[#allocation8 + $0x50] sm:$0xff] %v2146_v21  ;;  %v2147_v57 = vadd.f32 %v2664_v30, %v2284_v44  ;;  %v2084_v31 = vpop.f32.mrb[27].mxu0 }
 0x506   :  { %2160 = vst [vmem:[#allocation8 + $0x40] sm:$0xff] %v2144_v29  ;;  %v2145_v33 = vadd.f32 %v2284_v44, %v2084_v31 }
 0x507   :  { %2163 = vst [vmem:[#allocation8 + $0x58] sm:$0xff] %v2147_v57 }
 0x508   :  { %2161 = vst [vmem:[#allocation8 + $0x48] sm:$0xff] %v2145_v33 }
 0x50a   :  { %v2667_v47 = vpop.f32.mrb[28].mxu0 }
 0x50b   :  { %v2150_v34 = vadd.f32 %v2667_v47, %v2284_v44  ;;  %v2097_v49 = vpop.f32.mrb[29].mxu0 }
 0x50c   :  { %v2148_v25 = vadd.f32 %v2284_v44, %v2097_v49  ;;  %v2668_v51 = vpop.f32.mrb[30].mxu0 }
 0x50d   :  { %2166 = vst [vmem:[#allocation8 + $0x70] sm:$0xff] %v2150_v34  ;;  %v2151_v37 = vadd.f32 %v2668_v51, %v2284_v44  ;;  %v2100_v38 = vpop.f32.mrb[31].mxu0 }
 0x50e   :  { %2164 = vst [vmem:[#allocation8 + $0x60] sm:$0xff] %v2148_v25  ;;  %v2149_v40 = vadd.f32 %v2284_v44, %v2100_v38 }
 0x50f   :  { %2167 = vst [vmem:[#allocation8 + $0x78] sm:$0xff] %v2151_v37 }
 0x510   :  { %2165 = vst [vmem:[#allocation8 + $0x68] sm:$0xff] %v2149_v40 }
 0x511   :  { %2979 = shalt.err (!%p2976_p0)
}
 0x512   :  { %s2980_s10 = scalar_lea.hbm %s3372_s4, 2048 }
 0x513   :  { %p2981_p1 = scmp.ne.s32.totalorder %s3372_s4, %s2980_s10  ;;  %p2984_p2 = scmp.lt.u32.totalorder %s2980_s10, %s3372_s4 }
 0x515   :  { %p2986_p3 = pnand %p2984_p2, %p2981_p1 }
 0x517   :  { %2989 = shalt.err (!%p2986_p3)
}
 0x518   :  { %2179 = dma.vmem_to_hbm [thread:$0]  %s2174_s6, 2048, %s3372_s4, [#allocation4], %s2997_s25, %s2997_s25, %s2998_s26  }
 0x519   :  { %2994 = dma.done.wait [#allocation4], 2048  }
 0x51a   :  { %2995 = vsyncadd [#allocation4], 4294965248 }
 0x51b   :  { %2183 = vsyncpa [#allocation3], 1 }
 0x51c   :  { %2184 = vsyncpa [#allocation6], 1 }
 0x51d   :  { %2185 = vsyncpa [#allocation4], 1 }

</bundles_post_ra>
